<compile_context>
chip_gen: v5e
topology: v5e:2x2
jax: 0.10.0
libtpu: 0.0.40
codegen_flags: <defaults>
</compile_context>

<pallas_src>
import math
from functools import partial

import jax
import jax.numpy as jnp
from jax import lax
from jax.experimental import pallas as pl
from jax.experimental.pallas import tpu as pltpu

# ----- model hyper-parameters (small, consistent with the module) -----
VOCAB = 128
EMBED = 32
HIDDEN = 32          # bidirectional -> per-direction hidden = 16
N_LAYER = 1
N_HEAD = 4
B = 2
S = 8

VMEM_SPEC = pl.BlockSpec(memory_space=pltpu.MemorySpace.VMEM)

# ----- weight-slab row layout (all rows 128 lanes wide, bands sublane-aligned) -----
_R_WHH = 0      # 32 rows : hidden->gate weights (block-diagonal per direction)
_R_WQKV = 32    # 32 rows : attention in_proj weight (cols 96:128 zero-padded)
_R_BQKV = 64    # 1 row   : attention in_proj bias  (cols 96:128 zero-padded)
_R_WOUT = 72    # 32 rows : out_proj folded into predict head (32,128)
_R_BOUT = 104   # 1 row   : folded output bias (1,128)
_SLAB_ROWS = 112


# =====================================================================
# Fused forward kernel: BiLSTM recurrence + MHA + folded predict head
# =====================================================================
def _fused_kernel(*refs, n_head, hdir, seq, batch, has_mask):
    if has_mask:
        gx_ref, slab_ref, kbias_ref, out_ref = refs
    else:
        gx_ref, slab_ref, out_ref = refs
        kbias_ref = None

    f32 = jnp.float32
    hd = hdir                  # 16
    H2 = 2 * hd                # 32  (bidirectional hidden)
    G = 8 * hd                 # 128 (4 gates x 2 directions x hd) -> full lane width
    dh = H2 // n_head          # 8

    # ---- pre-projected gate inputs (embedding + W_ih folded at pack time) ----
    gx = gx_ref[...]                                           # (B, S, 128)

    # ---- weights: static sublane-aligned slices of the single slab (read once) ----
    w_hh  = slab_ref[_R_WHH:_R_WHH + H2, :]                    # (32, 128)
    wqkv  = slab_ref[_R_WQKV:_R_WQKV + H2, :]                  # (32, 128) cols 96: zero
    bqkv  = slab_ref[_R_BQKV:_R_BQKV + 1, :]                   # (1, 128)
    w_out = slab_ref[_R_WOUT:_R_WOUT + H2, :]                  # (32, 128) folded head
    b_out = slab_ref[_R_BOUT:_R_BOUT + 1, :]                   # (1, 128)

    # fwd direction occupies the first hd lanes of each 32-lane gate group
    lane_g = lax.broadcasted_iota(jnp.int32, (batch, G), 1)
    is_fwd_g = (lane_g % H2) < hd                              # (B, 128)
    lane_h = lax.broadcasted_iota(jnp.int32, (batch, H2), 1)
    is_fwd_h = lane_h < hd                                     # (B, 32)

    h = jnp.zeros((batch, H2), f32)                            # [h_fwd | h_bwd]
    c = jnp.zeros((batch, H2), f32)
    h_seq = [None] * seq

    # ---- fully-unrolled recurrence; fwd reads gx[t], bwd reads gx[S-1-t] ----
    for t in range(seq):
        gx_t = jnp.where(is_fwd_g, gx[:, t, :], gx[:, seq - 1 - t, :])      # (B, 128)
        gates = gx_t + jnp.dot(h, w_hh, preferred_element_type=f32)         # (B, 128)
        # two full-width transcendentals per step (plus tanh(c)) instead of 5 slices
        sig = jax.nn.sigmoid(gates)
        th = jnp.tanh(gates)
        i_g = sig[:, 0:H2]
        f_g = sig[:, H2:2 * H2]
        g_g = th[:, 2 * H2:3 * H2]
        o_g = sig[:, 3 * H2:4 * H2]
        c = f_g * c + i_g * g_g
        h = o_g * jnp.tanh(c)
        h_seq[t] = h                                           # full-width (B, 32)

    # bilstm output at absolute time t: fwd lanes from step t, bwd lanes from step S-1-t
    x_att = jnp.stack(
        [jnp.where(is_fwd_h, h_seq[t], h_seq[seq - 1 - t]) for t in range(seq)],
        axis=1)                                                # (B, S, 32)

    # ---- multi-head self-attention (nn.MultiheadAttention, eval mode) ----
    qkv = jnp.dot(x_att.reshape(batch * seq, H2), wqkv,
                  preferred_element_type=f32) + bqkv           # (B*S, 128)
    qkv = qkv.reshape(batch, seq, G)
    q = qkv[:, :, 0:H2]
    k = qkv[:, :, H2:2 * H2]
    v = qkv[:, :, 2 * H2:3 * H2]

    # heads stacked along the batch axis (row n = head*B + b) -> batched einsums
    q_s = jnp.concatenate([q[:, :, i * dh:(i + 1) * dh] for i in range(n_head)], axis=0)
    k_s = jnp.concatenate([k[:, :, i * dh:(i + 1) * dh] for i in range(n_head)], axis=0)
    v_s = jnp.concatenate([v[:, :, i * dh:(i + 1) * dh] for i in range(n_head)], axis=0)

    scale = 1.0 / math.sqrt(dh)
    scores = jnp.einsum('nqd,nkd->nqk', q_s, k_s,
                        preferred_element_type=f32) * scale    # (NH*B, S, S)
    if has_mask:
        kbias = kbias_ref[...]                                 # (B, S)
        kbias_s = jnp.concatenate([kbias] * n_head, axis=0)[:, None, :]
        scores = scores + kbias_s
    scores = scores - jnp.max(scores, axis=-1, keepdims=True)
    p = jnp.exp(scores)
    p = p * pl.reciprocal(jnp.sum(p, axis=-1, keepdims=True), approx=True)
    ctx = jnp.einsum('nqk,nkd->nqd', p, v_s, preferred_element_type=f32)   # (NH*B, S, dh)
    ctx = jnp.concatenate([ctx[i * batch:(i + 1) * batch] for i in range(n_head)],
                          axis=-1)                             # (B, S, 32)

    # ---- out_proj + linear + embedding^T all folded: one lane-dense matmul ----
    out_ref[...] = (jnp.dot(ctx.reshape(batch * seq, H2), w_out,
                            preferred_element_type=f32) + b_out).astype(out_ref.dtype)


# =====================================================================
# Parameter init (PyTorch-shaped, synthetic) and packing for the kernel
# =====================================================================
def init_params(key):
    def u(k, shape, scale=0.1):
        return jax.random.uniform(k, shape, jnp.float32, -scale, scale)

    hd = HIDDEN // 2
    keys = jax.random.split(key, 16)
    p = {"embedding": u(keys[0], (VOCAB, EMBED))}
    p["lstm"] = {
        "fwd": {"w_ih": u(keys[1], (4 * hd, EMBED)), "w_hh": u(keys[2], (4 * hd, hd)),
                "b_ih": u(keys[3], (4 * hd,)), "b_hh": u(keys[4], (4 * hd,))},
        "bwd": {"w_ih": u(keys[5], (4 * hd, EMBED)), "w_hh": u(keys[6], (4 * hd, hd)),
                "b_ih": u(keys[7], (4 * hd,)), "b_hh": u(keys[8], (4 * hd,))},
    }
    p["attn"] = {"in_proj_w": u(keys[9], (3 * HIDDEN, HIDDEN)),
                 "in_proj_b": u(keys[10], (3 * HIDDEN,)),
                 "out_proj_w": u(keys[11], (HIDDEN, HIDDEN)),
                 "out_proj_b": u(keys[12], (HIDDEN,))}
    p["linear"] = {"w": u(keys[13], (EMBED, HIDDEN)), "b": u(keys[14], (EMBED,))}
    return p


def pack_params(p):
    """Fold PyTorch-layout params into the fused-kernel layout (done once, outside)."""
    hd = HIDDEN // 2
    f, b = p["lstm"]["fwd"], p["lstm"]["bwd"]
    bias_f = f["b_ih"] + f["b_hh"]
    bias_b = b["b_ih"] + b["b_hh"]

    wih_rows, bias_rows = [], []
    w_hh = jnp.zeros((2 * hd, 8 * hd), jnp.float32)
    for gi in range(4):                      # PyTorch gate order: i, f, g, o
        sl = slice(gi * hd, (gi + 1) * hd)
        wih_rows += [f["w_ih"][sl], b["w_ih"][sl]]          # gate-major, fwd then bwd
        bias_rows += [bias_f[sl], bias_b[sl]]
        # block-diagonal hidden->gate weights (fwd hidden never feeds bwd gates, v.v.)
        w_hh = w_hh.at[0:hd, gi * 2 * hd: gi * 2 * hd + hd].set(f["w_hh"][sl].T)
        w_hh = w_hh.at[hd:2 * hd, gi * 2 * hd + hd: (gi + 1) * 2 * hd].set(b["w_hh"][sl].T)

    w_ih = jnp.concatenate(wih_rows, axis=0).T              # (E, 128)
    b_lstm = jnp.concatenate(bias_rows, axis=0)[None, :]    # (1, 128)

    emb = p["embedding"]                                     # (VOCAB, E)

    # fold embedding lookup + input projection: gx_table[tok] = emb[tok] @ w_ih + b
    gx_table = emb @ w_ih + b_lstm                           # (VOCAB, 128)

    # fold attention out_proj + linear + embedding^T into one (32,128) head
    w_pred = p["linear"]["w"].T @ emb.T                      # (H, V)
    b_pred = p["linear"]["b"] @ emb.T                        # (V,)
    wo = p["attn"]["out_proj_w"].T                           # (H, H)
    bo = p["attn"]["out_proj_b"]                             # (H,)
    w_out_fold = wo @ w_pred                                 # (H, V)
    b_out_fold = bo @ w_pred + b_pred                        # (V,)

    # single weight slab (112, 128), sublane-aligned bands
    slab = jnp.zeros((_SLAB_ROWS, VOCAB), jnp.float32)
    slab = slab.at[_R_WHH:_R_WHH + HIDDEN, :].set(w_hh)
    slab = slab.at[_R_WQKV:_R_WQKV + HIDDEN, 0:3 * HIDDEN].set(p["attn"]["in_proj_w"].T)
    slab = slab.at[_R_BQKV, 0:3 * HIDDEN].set(p["attn"]["in_proj_b"])
    slab = slab.at[_R_WOUT:_R_WOUT + HIDDEN, :].set(w_out_fold)
    slab = slab.at[_R_BOUT, :].set(b_out_fold)

    return {"gx_table": gx_table, "slab": slab}


# =====================================================================
# Forward wrapper (gate-table gather + single fused pallas_call)
# =====================================================================
def bilstm_attn_forward(packed, token_ids, key_padding_mask=None):
    """token_ids: (B, S) int32; key_padding_mask: optional (B, S) bool (True = pad)."""
    b, s = token_ids.shape
    # lane-dense (B,S,128) row gather of pre-projected LSTM gate inputs
    gx = jnp.take(packed["gx_table"], token_ids, axis=0)

    has_mask = key_padding_mask is not None
    args = [gx, packed["slab"]]
    if has_mask:
        args.append(jnp.where(key_padding_mask, -1e30, 0.0).astype(jnp.float32))

    kernel = partial(_fused_kernel, n_head=N_HEAD, hdir=HIDDEN // 2,
                     seq=s, batch=b, has_mask=has_mask)
    logits = pl.pallas_call(
        kernel,
        out_shape=jax.ShapeDtypeStruct((b * s, VOCAB), jnp.float32),
        in_specs=[VMEM_SPEC] * len(args),
        out_specs=VMEM_SPEC,
    )(*args)
    return logits.reshape(b, s, VOCAB)


if __name__ == "__main__":
    key = jax.random.PRNGKey(0)
    pkey, dkey = jax.random.split(key)
    raw_params = init_params(pkey)
    packed = pack_params(raw_params)
    token_ids = jax.random.randint(dkey, (B, S), 0, VOCAB, dtype=jnp.int32)

    forward = jax.jit(bilstm_attn_forward)
    logits = jax.block_until_ready(forward(packed, token_ids))   # mask defaults to None

    assert logits.shape == (B, S, VOCAB), logits.shape
    assert bool(jnp.all(jnp.isfinite(logits)))
    print("KERNEL_OK")
</pallas_src>

<mosaic_0001>
module attributes {stable_mosaic.version = 11 : i64} {
  func.func @_fused_kernel(%arg0: memref<2x8x128xf32, #tpu.memory_space<vmem>>, %arg1: memref<112x128xf32, #tpu.memory_space<vmem>>, %arg2: memref<16x128xf32, #tpu.memory_space<vmem>>) attributes {dimension_semantics = [], scalar_prefetch = 0 : i64, scratch_operands = 0 : i64, tpu.core_type = #tpu.core_type<tc>} {
    %c0 = arith.constant 0 : index
    %c0_0 = arith.constant 0 : index
    %c0_1 = arith.constant 0 : index
    %0 = vector.load %arg0[%c0, %c0_0, %c0_1] : memref<2x8x128xf32, #tpu.memory_space<vmem>>, vector<2x8x128xf32>
    %c0_2 = arith.constant 0 : index
    %c0_3 = arith.constant 0 : index
    %1 = vector.load %arg1[%c0_2, %c0_3] : memref<112x128xf32, #tpu.memory_space<vmem>>, vector<32x128xf32>
    %c32 = arith.constant 32 : index
    %c0_4 = arith.constant 0 : index
    %2 = vector.load %arg1[%c32, %c0_4] : memref<112x128xf32, #tpu.memory_space<vmem>>, vector<32x128xf32>
    %c64 = arith.constant 64 : index
    %c0_5 = arith.constant 0 : index
    %3 = vector.load %arg1[%c64, %c0_5] : memref<112x128xf32, #tpu.memory_space<vmem>>, vector<1x128xf32>
    %c72 = arith.constant 72 : index
    %c0_6 = arith.constant 0 : index
    %4 = vector.load %arg1[%c72, %c0_6] : memref<112x128xf32, #tpu.memory_space<vmem>>, vector<32x128xf32>
    %c104 = arith.constant 104 : index
    %c0_7 = arith.constant 0 : index
    %5 = vector.load %arg1[%c104, %c0_7] : memref<112x128xf32, #tpu.memory_space<vmem>>, vector<1x128xf32>
    %6 = tpu.iota {dimensions = array<i32: 1>} : vector<2x128xi32>
    %c32_i32 = arith.constant 32 : i32
    %c0_i32 = arith.constant 0 : i32
    %7 = arith.cmpi eq, %c32_i32, %c0_i32 : i32
    %c1_i32 = arith.constant 1 : i32
    %8 = arith.select %7, %c1_i32, %c32_i32 : i32
    %9 = vector.broadcast %8 : i32 to vector<2x128xi32>
    %10 = arith.remsi %6, %9 : vector<2x128xi32>
    %c0_i32_8 = arith.constant 0 : i32
    %11 = vector.broadcast %c0_i32_8 : i32 to vector<2x128xi32>
    %12 = arith.cmpi ne, %10, %11 : vector<2x128xi32>
    %c0_i32_9 = arith.constant 0 : i32
    %13 = vector.broadcast %c0_i32_9 : i32 to vector<2x128xi32>
    %14 = arith.cmpi slt, %10, %13 : vector<2x128xi32>
    %c0_i32_10 = arith.constant 0 : i32
    %15 = arith.cmpi slt, %8, %c0_i32_10 : i32
    %16 = vector.broadcast %15 : i1 to vector<2x128xi1>
    %17 = vector.broadcast %16 : vector<2x128xi1> to vector<2x128xi1>
    %18 = arith.xori %14, %17 : vector<2x128xi1>
    %19 = arith.andi %18, %12 : vector<2x128xi1>
    %20 = vector.broadcast %8 : i32 to vector<2x128xi32>
    %21 = arith.addi %10, %20 : vector<2x128xi32>
    %22 = arith.select %19, %21, %10 : vector<2x128xi1>, vector<2x128xi32>
    %c16_i32 = arith.constant 16 : i32
    %23 = vector.broadcast %c16_i32 : i32 to vector<2x128xi32>
    %24 = arith.cmpi slt, %22, %23 : vector<2x128xi32>
    %25 = tpu.iota {dimensions = array<i32: 1>} : vector<2x32xi32>
    %c16_i32_11 = arith.constant 16 : i32
    %26 = vector.broadcast %c16_i32_11 : i32 to vector<2x32xi32>
    %27 = arith.cmpi slt, %25, %26 : vector<2x32xi32>
    %cst = arith.constant 0.000000e+00 : f32
    %28 = vector.broadcast %cst : f32 to vector<2x32xf32>
    %cst_12 = arith.constant 0.000000e+00 : f32
    %29 = vector.broadcast %cst_12 : f32 to vector<2x32xf32>
    %30 = vector.extract_strided_slice %0 {offsets = [0, 0, 0], sizes = [2, 1, 128], strides = [1, 1, 1]} : vector<2x8x128xf32> to vector<2x1x128xf32>
    %31 = vector.shape_cast %30 : vector<2x1x128xf32> to vector<2x128xf32>
    %32 = vector.extract_strided_slice %0 {offsets = [0, 7, 0], sizes = [2, 1, 128], strides = [1, 1, 1]} : vector<2x8x128xf32> to vector<2x1x128xf32>
    %33 = vector.shape_cast %32 : vector<2x1x128xf32> to vector<2x128xf32>
    %34 = arith.select %24, %31, %33 : vector<2x128xi1>, vector<2x128xf32>
    %cst_13 = arith.constant dense<0.000000e+00> : vector<2x128xf32>
    %35 = tpu.matmul %28, %1, %cst_13 {dimension_numbers = #tpu.dot_dimension_numbers<[1], [0], [0], [1], [0, 0, 1, 1], [], []>} : vector<2x32xf32>, vector<32x128xf32>, vector<2x128xf32> -> vector<2x128xf32>
    %36 = arith.addf %34, %35 : vector<2x128xf32>
    %37 = arith.negf %36 : vector<2x128xf32>
    %38 = math.exp %37 : vector<2x128xf32>
    %cst_14 = arith.constant 1.000000e+00 : f32
    %39 = vector.broadcast %cst_14 : f32 to vector<2x128xf32>
    %40 = arith.addf %39, %38 : vector<2x128xf32>
    %41 = arith.divf %39, %40 : vector<2x128xf32>
    %42 = math.tanh %36 : vector<2x128xf32>
    %43 = vector.extract_strided_slice %41 {offsets = [0, 0], sizes = [2, 32], strides = [1, 1]} : vector<2x128xf32> to vector<2x32xf32>
    %44 = vector.extract_strided_slice %41 {offsets = [0, 32], sizes = [2, 32], strides = [1, 1]} : vector<2x128xf32> to vector<2x32xf32>
    %45 = vector.extract_strided_slice %42 {offsets = [0, 64], sizes = [2, 32], strides = [1, 1]} : vector<2x128xf32> to vector<2x32xf32>
    %46 = vector.extract_strided_slice %41 {offsets = [0, 96], sizes = [2, 32], strides = [1, 1]} : vector<2x128xf32> to vector<2x32xf32>
    %47 = arith.mulf %44, %29 : vector<2x32xf32>
    %48 = arith.mulf %43, %45 : vector<2x32xf32>
    %49 = arith.addf %47, %48 : vector<2x32xf32>
    %50 = math.tanh %49 : vector<2x32xf32>
    %51 = arith.mulf %46, %50 : vector<2x32xf32>
    %52 = vector.extract_strided_slice %0 {offsets = [0, 1, 0], sizes = [2, 1, 128], strides = [1, 1, 1]} : vector<2x8x128xf32> to vector<2x1x128xf32>
    %53 = vector.shape_cast %52 : vector<2x1x128xf32> to vector<2x128xf32>
    %54 = vector.extract_strided_slice %0 {offsets = [0, 6, 0], sizes = [2, 1, 128], strides = [1, 1, 1]} : vector<2x8x128xf32> to vector<2x1x128xf32>
    %55 = vector.shape_cast %54 : vector<2x1x128xf32> to vector<2x128xf32>
    %56 = arith.select %24, %53, %55 : vector<2x128xi1>, vector<2x128xf32>
    %cst_15 = arith.constant dense<0.000000e+00> : vector<2x128xf32>
    %57 = tpu.matmul %51, %1, %cst_15 {dimension_numbers = #tpu.dot_dimension_numbers<[1], [0], [0], [1], [0, 0, 1, 1], [], []>} : vector<2x32xf32>, vector<32x128xf32>, vector<2x128xf32> -> vector<2x128xf32>
    %58 = arith.addf %56, %57 : vector<2x128xf32>
    %59 = arith.negf %58 : vector<2x128xf32>
    %60 = math.exp %59 : vector<2x128xf32>
    %cst_16 = arith.constant 1.000000e+00 : f32
    %61 = vector.broadcast %cst_16 : f32 to vector<2x128xf32>
    %62 = arith.addf %61, %60 : vector<2x128xf32>
    %63 = arith.divf %61, %62 : vector<2x128xf32>
    %64 = math.tanh %58 : vector<2x128xf32>
    %65 = vector.extract_strided_slice %63 {offsets = [0, 0], sizes = [2, 32], strides = [1, 1]} : vector<2x128xf32> to vector<2x32xf32>
    %66 = vector.extract_strided_slice %63 {offsets = [0, 32], sizes = [2, 32], strides = [1, 1]} : vector<2x128xf32> to vector<2x32xf32>
    %67 = vector.extract_strided_slice %64 {offsets = [0, 64], sizes = [2, 32], strides = [1, 1]} : vector<2x128xf32> to vector<2x32xf32>
    %68 = vector.extract_strided_slice %63 {offsets = [0, 96], sizes = [2, 32], strides = [1, 1]} : vector<2x128xf32> to vector<2x32xf32>
    %69 = arith.mulf %66, %49 : vector<2x32xf32>
    %70 = arith.mulf %65, %67 : vector<2x32xf32>
    %71 = arith.addf %69, %70 : vector<2x32xf32>
    %72 = math.tanh %71 : vector<2x32xf32>
    %73 = arith.mulf %68, %72 : vector<2x32xf32>
    %74 = vector.extract_strided_slice %0 {offsets = [0, 2, 0], sizes = [2, 1, 128], strides = [1, 1, 1]} : vector<2x8x128xf32> to vector<2x1x128xf32>
    %75 = vector.shape_cast %74 : vector<2x1x128xf32> to vector<2x128xf32>
    %76 = vector.extract_strided_slice %0 {offsets = [0, 5, 0], sizes = [2, 1, 128], strides = [1, 1, 1]} : vector<2x8x128xf32> to vector<2x1x128xf32>
    %77 = vector.shape_cast %76 : vector<2x1x128xf32> to vector<2x128xf32>
    %78 = arith.select %24, %75, %77 : vector<2x128xi1>, vector<2x128xf32>
    %cst_17 = arith.constant dense<0.000000e+00> : vector<2x128xf32>
    %79 = tpu.matmul %73, %1, %cst_17 {dimension_numbers = #tpu.dot_dimension_numbers<[1], [0], [0], [1], [0, 0, 1, 1], [], []>} : vector<2x32xf32>, vector<32x128xf32>, vector<2x128xf32> -> vector<2x128xf32>
    %80 = arith.addf %78, %79 : vector<2x128xf32>
    %81 = arith.negf %80 : vector<2x128xf32>
    %82 = math.exp %81 : vector<2x128xf32>
    %cst_18 = arith.constant 1.000000e+00 : f32
    %83 = vector.broadcast %cst_18 : f32 to vector<2x128xf32>
    %84 = arith.addf %83, %82 : vector<2x128xf32>
    %85 = arith.divf %83, %84 : vector<2x128xf32>
    %86 = math.tanh %80 : vector<2x128xf32>
    %87 = vector.extract_strided_slice %85 {offsets = [0, 0], sizes = [2, 32], strides = [1, 1]} : vector<2x128xf32> to vector<2x32xf32>
    %88 = vector.extract_strided_slice %85 {offsets = [0, 32], sizes = [2, 32], strides = [1, 1]} : vector<2x128xf32> to vector<2x32xf32>
    %89 = vector.extract_strided_slice %86 {offsets = [0, 64], sizes = [2, 32], strides = [1, 1]} : vector<2x128xf32> to vector<2x32xf32>
    %90 = vector.extract_strided_slice %85 {offsets = [0, 96], sizes = [2, 32], strides = [1, 1]} : vector<2x128xf32> to vector<2x32xf32>
    %91 = arith.mulf %88, %71 : vector<2x32xf32>
    %92 = arith.mulf %87, %89 : vector<2x32xf32>
    %93 = arith.addf %91, %92 : vector<2x32xf32>
    %94 = math.tanh %93 : vector<2x32xf32>
    %95 = arith.mulf %90, %94 : vector<2x32xf32>
    %96 = vector.extract_strided_slice %0 {offsets = [0, 3, 0], sizes = [2, 1, 128], strides = [1, 1, 1]} : vector<2x8x128xf32> to vector<2x1x128xf32>
    %97 = vector.shape_cast %96 : vector<2x1x128xf32> to vector<2x128xf32>
    %98 = vector.extract_strided_slice %0 {offsets = [0, 4, 0], sizes = [2, 1, 128], strides = [1, 1, 1]} : vector<2x8x128xf32> to vector<2x1x128xf32>
    %99 = vector.shape_cast %98 : vector<2x1x128xf32> to vector<2x128xf32>
    %100 = arith.select %24, %97, %99 : vector<2x128xi1>, vector<2x128xf32>
    %cst_19 = arith.constant dense<0.000000e+00> : vector<2x128xf32>
    %101 = tpu.matmul %95, %1, %cst_19 {dimension_numbers = #tpu.dot_dimension_numbers<[1], [0], [0], [1], [0, 0, 1, 1], [], []>} : vector<2x32xf32>, vector<32x128xf32>, vector<2x128xf32> -> vector<2x128xf32>
    %102 = arith.addf %100, %101 : vector<2x128xf32>
    %103 = arith.negf %102 : vector<2x128xf32>
    %104 = math.exp %103 : vector<2x128xf32>
    %cst_20 = arith.constant 1.000000e+00 : f32
    %105 = vector.broadcast %cst_20 : f32 to vector<2x128xf32>
    %106 = arith.addf %105, %104 : vector<2x128xf32>
    %107 = arith.divf %105, %106 : vector<2x128xf32>
    %108 = math.tanh %102 : vector<2x128xf32>
    %109 = vector.extract_strided_slice %107 {offsets = [0, 0], sizes = [2, 32], strides = [1, 1]} : vector<2x128xf32> to vector<2x32xf32>
    %110 = vector.extract_strided_slice %107 {offsets = [0, 32], sizes = [2, 32], strides = [1, 1]} : vector<2x128xf32> to vector<2x32xf32>
    %111 = vector.extract_strided_slice %108 {offsets = [0, 64], sizes = [2, 32], strides = [1, 1]} : vector<2x128xf32> to vector<2x32xf32>
    %112 = vector.extract_strided_slice %107 {offsets = [0, 96], sizes = [2, 32], strides = [1, 1]} : vector<2x128xf32> to vector<2x32xf32>
    %113 = arith.mulf %110, %93 : vector<2x32xf32>
    %114 = arith.mulf %109, %111 : vector<2x32xf32>
    %115 = arith.addf %113, %114 : vector<2x32xf32>
    %116 = math.tanh %115 : vector<2x32xf32>
    %117 = arith.mulf %112, %116 : vector<2x32xf32>
    %118 = vector.extract_strided_slice %0 {offsets = [0, 4, 0], sizes = [2, 1, 128], strides = [1, 1, 1]} : vector<2x8x128xf32> to vector<2x1x128xf32>
    %119 = vector.shape_cast %118 : vector<2x1x128xf32> to vector<2x128xf32>
    %120 = vector.extract_strided_slice %0 {offsets = [0, 3, 0], sizes = [2, 1, 128], strides = [1, 1, 1]} : vector<2x8x128xf32> to vector<2x1x128xf32>
    %121 = vector.shape_cast %120 : vector<2x1x128xf32> to vector<2x128xf32>
    %122 = arith.select %24, %119, %121 : vector<2x128xi1>, vector<2x128xf32>
    %cst_21 = arith.constant dense<0.000000e+00> : vector<2x128xf32>
    %123 = tpu.matmul %117, %1, %cst_21 {dimension_numbers = #tpu.dot_dimension_numbers<[1], [0], [0], [1], [0, 0, 1, 1], [], []>} : vector<2x32xf32>, vector<32x128xf32>, vector<2x128xf32> -> vector<2x128xf32>
    %124 = arith.addf %122, %123 : vector<2x128xf32>
    %125 = arith.negf %124 : vector<2x128xf32>
    %126 = math.exp %125 : vector<2x128xf32>
    %cst_22 = arith.constant 1.000000e+00 : f32
    %127 = vector.broadcast %cst_22 : f32 to vector<2x128xf32>
    %128 = arith.addf %127, %126 : vector<2x128xf32>
    %129 = arith.divf %127, %128 : vector<2x128xf32>
    %130 = math.tanh %124 : vector<2x128xf32>
    %131 = vector.extract_strided_slice %129 {offsets = [0, 0], sizes = [2, 32], strides = [1, 1]} : vector<2x128xf32> to vector<2x32xf32>
    %132 = vector.extract_strided_slice %129 {offsets = [0, 32], sizes = [2, 32], strides = [1, 1]} : vector<2x128xf32> to vector<2x32xf32>
    %133 = vector.extract_strided_slice %130 {offsets = [0, 64], sizes = [2, 32], strides = [1, 1]} : vector<2x128xf32> to vector<2x32xf32>
    %134 = vector.extract_strided_slice %129 {offsets = [0, 96], sizes = [2, 32], strides = [1, 1]} : vector<2x128xf32> to vector<2x32xf32>
    %135 = arith.mulf %132, %115 : vector<2x32xf32>
    %136 = arith.mulf %131, %133 : vector<2x32xf32>
    %137 = arith.addf %135, %136 : vector<2x32xf32>
    %138 = math.tanh %137 : vector<2x32xf32>
    %139 = arith.mulf %134, %138 : vector<2x32xf32>
    %140 = vector.extract_strided_slice %0 {offsets = [0, 5, 0], sizes = [2, 1, 128], strides = [1, 1, 1]} : vector<2x8x128xf32> to vector<2x1x128xf32>
    %141 = vector.shape_cast %140 : vector<2x1x128xf32> to vector<2x128xf32>
    %142 = vector.extract_strided_slice %0 {offsets = [0, 2, 0], sizes = [2, 1, 128], strides = [1, 1, 1]} : vector<2x8x128xf32> to vector<2x1x128xf32>
    %143 = vector.shape_cast %142 : vector<2x1x128xf32> to vector<2x128xf32>
    %144 = arith.select %24, %141, %143 : vector<2x128xi1>, vector<2x128xf32>
    %cst_23 = arith.constant dense<0.000000e+00> : vector<2x128xf32>
    %145 = tpu.matmul %139, %1, %cst_23 {dimension_numbers = #tpu.dot_dimension_numbers<[1], [0], [0], [1], [0, 0, 1, 1], [], []>} : vector<2x32xf32>, vector<32x128xf32>, vector<2x128xf32> -> vector<2x128xf32>
    %146 = arith.addf %144, %145 : vector<2x128xf32>
    %147 = arith.negf %146 : vector<2x128xf32>
    %148 = math.exp %147 : vector<2x128xf32>
    %cst_24 = arith.constant 1.000000e+00 : f32
    %149 = vector.broadcast %cst_24 : f32 to vector<2x128xf32>
    %150 = arith.addf %149, %148 : vector<2x128xf32>
    %151 = arith.divf %149, %150 : vector<2x128xf32>
    %152 = math.tanh %146 : vector<2x128xf32>
    %153 = vector.extract_strided_slice %151 {offsets = [0, 0], sizes = [2, 32], strides = [1, 1]} : vector<2x128xf32> to vector<2x32xf32>
    %154 = vector.extract_strided_slice %151 {offsets = [0, 32], sizes = [2, 32], strides = [1, 1]} : vector<2x128xf32> to vector<2x32xf32>
    %155 = vector.extract_strided_slice %152 {offsets = [0, 64], sizes = [2, 32], strides = [1, 1]} : vector<2x128xf32> to vector<2x32xf32>
    %156 = vector.extract_strided_slice %151 {offsets = [0, 96], sizes = [2, 32], strides = [1, 1]} : vector<2x128xf32> to vector<2x32xf32>
    %157 = arith.mulf %154, %137 : vector<2x32xf32>
    %158 = arith.mulf %153, %155 : vector<2x32xf32>
    %159 = arith.addf %157, %158 : vector<2x32xf32>
    %160 = math.tanh %159 : vector<2x32xf32>
    %161 = arith.mulf %156, %160 : vector<2x32xf32>
    %162 = vector.extract_strided_slice %0 {offsets = [0, 6, 0], sizes = [2, 1, 128], strides = [1, 1, 1]} : vector<2x8x128xf32> to vector<2x1x128xf32>
    %163 = vector.shape_cast %162 : vector<2x1x128xf32> to vector<2x128xf32>
    %164 = vector.extract_strided_slice %0 {offsets = [0, 1, 0], sizes = [2, 1, 128], strides = [1, 1, 1]} : vector<2x8x128xf32> to vector<2x1x128xf32>
    %165 = vector.shape_cast %164 : vector<2x1x128xf32> to vector<2x128xf32>
    %166 = arith.select %24, %163, %165 : vector<2x128xi1>, vector<2x128xf32>
    %cst_25 = arith.constant dense<0.000000e+00> : vector<2x128xf32>
    %167 = tpu.matmul %161, %1, %cst_25 {dimension_numbers = #tpu.dot_dimension_numbers<[1], [0], [0], [1], [0, 0, 1, 1], [], []>} : vector<2x32xf32>, vector<32x128xf32>, vector<2x128xf32> -> vector<2x128xf32>
    %168 = arith.addf %166, %167 : vector<2x128xf32>
    %169 = arith.negf %168 : vector<2x128xf32>
    %170 = math.exp %169 : vector<2x128xf32>
    %cst_26 = arith.constant 1.000000e+00 : f32
    %171 = vector.broadcast %cst_26 : f32 to vector<2x128xf32>
    %172 = arith.addf %171, %170 : vector<2x128xf32>
    %173 = arith.divf %171, %172 : vector<2x128xf32>
    %174 = math.tanh %168 : vector<2x128xf32>
    %175 = vector.extract_strided_slice %173 {offsets = [0, 0], sizes = [2, 32], strides = [1, 1]} : vector<2x128xf32> to vector<2x32xf32>
    %176 = vector.extract_strided_slice %173 {offsets = [0, 32], sizes = [2, 32], strides = [1, 1]} : vector<2x128xf32> to vector<2x32xf32>
    %177 = vector.extract_strided_slice %174 {offsets = [0, 64], sizes = [2, 32], strides = [1, 1]} : vector<2x128xf32> to vector<2x32xf32>
    %178 = vector.extract_strided_slice %173 {offsets = [0, 96], sizes = [2, 32], strides = [1, 1]} : vector<2x128xf32> to vector<2x32xf32>
    %179 = arith.mulf %176, %159 : vector<2x32xf32>
    %180 = arith.mulf %175, %177 : vector<2x32xf32>
    %181 = arith.addf %179, %180 : vector<2x32xf32>
    %182 = math.tanh %181 : vector<2x32xf32>
    %183 = arith.mulf %178, %182 : vector<2x32xf32>
    %184 = vector.extract_strided_slice %0 {offsets = [0, 7, 0], sizes = [2, 1, 128], strides = [1, 1, 1]} : vector<2x8x128xf32> to vector<2x1x128xf32>
    %185 = vector.shape_cast %184 : vector<2x1x128xf32> to vector<2x128xf32>
    %186 = vector.extract_strided_slice %0 {offsets = [0, 0, 0], sizes = [2, 1, 128], strides = [1, 1, 1]} : vector<2x8x128xf32> to vector<2x1x128xf32>
    %187 = vector.shape_cast %186 : vector<2x1x128xf32> to vector<2x128xf32>
    %188 = arith.select %24, %185, %187 : vector<2x128xi1>, vector<2x128xf32>
    %cst_27 = arith.constant dense<0.000000e+00> : vector<2x128xf32>
    %189 = tpu.matmul %183, %1, %cst_27 {dimension_numbers = #tpu.dot_dimension_numbers<[1], [0], [0], [1], [0, 0, 1, 1], [], []>} : vector<2x32xf32>, vector<32x128xf32>, vector<2x128xf32> -> vector<2x128xf32>
    %190 = arith.addf %188, %189 : vector<2x128xf32>
    %191 = arith.negf %190 : vector<2x128xf32>
    %192 = math.exp %191 : vector<2x128xf32>
    %cst_28 = arith.constant 1.000000e+00 : f32
    %193 = vector.broadcast %cst_28 : f32 to vector<2x128xf32>
    %194 = arith.addf %193, %192 : vector<2x128xf32>
    %195 = arith.divf %193, %194 : vector<2x128xf32>
    %196 = math.tanh %190 : vector<2x128xf32>
    %197 = vector.extract_strided_slice %195 {offsets = [0, 0], sizes = [2, 32], strides = [1, 1]} : vector<2x128xf32> to vector<2x32xf32>
    %198 = vector.extract_strided_slice %195 {offsets = [0, 32], sizes = [2, 32], strides = [1, 1]} : vector<2x128xf32> to vector<2x32xf32>
    %199 = vector.extract_strided_slice %196 {offsets = [0, 64], sizes = [2, 32], strides = [1, 1]} : vector<2x128xf32> to vector<2x32xf32>
    %200 = vector.extract_strided_slice %195 {offsets = [0, 96], sizes = [2, 32], strides = [1, 1]} : vector<2x128xf32> to vector<2x32xf32>
    %201 = arith.mulf %198, %181 : vector<2x32xf32>
    %202 = arith.mulf %197, %199 : vector<2x32xf32>
    %203 = arith.addf %201, %202 : vector<2x32xf32>
    %204 = math.tanh %203 : vector<2x32xf32>
    %205 = arith.mulf %200, %204 : vector<2x32xf32>
    %206 = arith.select %27, %51, %205 : vector<2x32xi1>, vector<2x32xf32>
    %207 = arith.select %27, %73, %183 : vector<2x32xi1>, vector<2x32xf32>
    %208 = arith.select %27, %95, %161 : vector<2x32xi1>, vector<2x32xf32>
    %209 = arith.select %27, %117, %139 : vector<2x32xi1>, vector<2x32xf32>
    %210 = arith.select %27, %139, %117 : vector<2x32xi1>, vector<2x32xf32>
    %211 = arith.select %27, %161, %95 : vector<2x32xi1>, vector<2x32xf32>
    %212 = arith.select %27, %183, %73 : vector<2x32xi1>, vector<2x32xf32>
    %213 = arith.select %27, %205, %51 : vector<2x32xi1>, vector<2x32xf32>
    %214 = vector.shape_cast %206 : vector<2x32xf32> to vector<2x1x32xf32>
    %215 = vector.shape_cast %207 : vector<2x32xf32> to vector<2x1x32xf32>
    %216 = vector.shape_cast %208 : vector<2x32xf32> to vector<2x1x32xf32>
    %217 = vector.shape_cast %209 : vector<2x32xf32> to vector<2x1x32xf32>
    %218 = vector.shape_cast %210 : vector<2x32xf32> to vector<2x1x32xf32>
    %219 = vector.shape_cast %211 : vector<2x32xf32> to vector<2x1x32xf32>
    %220 = vector.shape_cast %212 : vector<2x32xf32> to vector<2x1x32xf32>
    %221 = vector.shape_cast %213 : vector<2x32xf32> to vector<2x1x32xf32>
    %222 = tpu.concatenate %214, %215, %216, %217, %218, %219, %220, %221 in 1 : vector<2x1x32xf32>, vector<2x1x32xf32>, vector<2x1x32xf32>, vector<2x1x32xf32>, vector<2x1x32xf32>, vector<2x1x32xf32>, vector<2x1x32xf32>, vector<2x1x32xf32> -> vector<2x8x32xf32>
    %223 = vector.shape_cast %222 : vector<2x8x32xf32> to vector<16x32xf32>
    %cst_29 = arith.constant dense<0.000000e+00> : vector<16x128xf32>
    %224 = tpu.matmul %223, %2, %cst_29 {dimension_numbers = #tpu.dot_dimension_numbers<[1], [0], [0], [1], [0, 0, 1, 1], [], []>} : vector<16x32xf32>, vector<32x128xf32>, vector<16x128xf32> -> vector<16x128xf32>
    %225 = vector.broadcast %3 : vector<1x128xf32> to vector<16x128xf32>
    %226 = arith.addf %224, %225 : vector<16x128xf32>
    %227 = vector.shape_cast %226 : vector<16x128xf32> to vector<2x8x128xf32>
    %228 = vector.extract_strided_slice %227 {offsets = [0, 0, 0], sizes = [2, 8, 32], strides = [1, 1, 1]} : vector<2x8x128xf32> to vector<2x8x32xf32>
    %229 = vector.extract_strided_slice %227 {offsets = [0, 0, 32], sizes = [2, 8, 32], strides = [1, 1, 1]} : vector<2x8x128xf32> to vector<2x8x32xf32>
    %230 = vector.extract_strided_slice %227 {offsets = [0, 0, 64], sizes = [2, 8, 32], strides = [1, 1, 1]} : vector<2x8x128xf32> to vector<2x8x32xf32>
    %231 = vector.extract_strided_slice %228 {offsets = [0, 0, 0], sizes = [2, 8, 8], strides = [1, 1, 1]} : vector<2x8x32xf32> to vector<2x8x8xf32>
    %232 = vector.extract_strided_slice %228 {offsets = [0, 0, 8], sizes = [2, 8, 8], strides = [1, 1, 1]} : vector<2x8x32xf32> to vector<2x8x8xf32>
    %233 = vector.extract_strided_slice %228 {offsets = [0, 0, 16], sizes = [2, 8, 8], strides = [1, 1, 1]} : vector<2x8x32xf32> to vector<2x8x8xf32>
    %234 = vector.extract_strided_slice %228 {offsets = [0, 0, 24], sizes = [2, 8, 8], strides = [1, 1, 1]} : vector<2x8x32xf32> to vector<2x8x8xf32>
    %235 = tpu.concatenate %231, %232, %233, %234 in 0 : vector<2x8x8xf32>, vector<2x8x8xf32>, vector<2x8x8xf32>, vector<2x8x8xf32> -> vector<8x8x8xf32>
    %236 = vector.extract_strided_slice %229 {offsets = [0, 0, 0], sizes = [2, 8, 8], strides = [1, 1, 1]} : vector<2x8x32xf32> to vector<2x8x8xf32>
    %237 = vector.extract_strided_slice %229 {offsets = [0, 0, 8], sizes = [2, 8, 8], strides = [1, 1, 1]} : vector<2x8x32xf32> to vector<2x8x8xf32>
    %238 = vector.extract_strided_slice %229 {offsets = [0, 0, 16], sizes = [2, 8, 8], strides = [1, 1, 1]} : vector<2x8x32xf32> to vector<2x8x8xf32>
    %239 = vector.extract_strided_slice %229 {offsets = [0, 0, 24], sizes = [2, 8, 8], strides = [1, 1, 1]} : vector<2x8x32xf32> to vector<2x8x8xf32>
    %240 = tpu.concatenate %236, %237, %238, %239 in 0 : vector<2x8x8xf32>, vector<2x8x8xf32>, vector<2x8x8xf32>, vector<2x8x8xf32> -> vector<8x8x8xf32>
    %241 = vector.extract_strided_slice %230 {offsets = [0, 0, 0], sizes = [2, 8, 8], strides = [1, 1, 1]} : vector<2x8x32xf32> to vector<2x8x8xf32>
    %242 = vector.extract_strided_slice %230 {offsets = [0, 0, 8], sizes = [2, 8, 8], strides = [1, 1, 1]} : vector<2x8x32xf32> to vector<2x8x8xf32>
    %243 = vector.extract_strided_slice %230 {offsets = [0, 0, 16], sizes = [2, 8, 8], strides = [1, 1, 1]} : vector<2x8x32xf32> to vector<2x8x8xf32>
    %244 = vector.extract_strided_slice %230 {offsets = [0, 0, 24], sizes = [2, 8, 8], strides = [1, 1, 1]} : vector<2x8x32xf32> to vector<2x8x8xf32>
    %245 = tpu.concatenate %241, %242, %243, %244 in 0 : vector<2x8x8xf32>, vector<2x8x8xf32>, vector<2x8x8xf32>, vector<2x8x8xf32> -> vector<8x8x8xf32>
    "tpu.trace_start"() <{level = 10 : i32, message = "nqd,nkd->nqk"}> : () -> ()
    %cst_30 = arith.constant dense<0.000000e+00> : vector<8x8x8xf32>
    %246 = tpu.matmul %235, %240, %cst_30 {dimension_numbers = #tpu.dot_dimension_numbers<[2], [2], [1], [1], [0, 0, 0, 1, 1, 1], [0], [0]>} : vector<8x8x8xf32>, vector<8x8x8xf32>, vector<8x8x8xf32> -> vector<8x8x8xf32>
    "tpu.trace_stop"() : () -> ()
    %cst_31 = arith.constant 0.353553385 : f32
    %247 = vector.broadcast %cst_31 : f32 to vector<8x8x8xf32>
    %248 = arith.mulf %246, %247 : vector<8x8x8xf32>
    %cst_32 = arith.constant dense<0xFF800000> : vector<8x8xf32>
    %249 = vector.multi_reduction <maximumf>, %248, %cst_32 [2] : vector<8x8x8xf32> to vector<8x8xf32>
    %250 = vector.shape_cast %249 : vector<8x8xf32> to vector<8x8x1xf32>
    %251 = vector.broadcast %250 : vector<8x8x1xf32> to vector<8x8x8xf32>
    %252 = arith.subf %248, %251 : vector<8x8x8xf32>
    %253 = math.exp %252 : vector<8x8x8xf32>
    %cst_33 = arith.constant dense<0.000000e+00> : vector<8x8xf32>
    %254 = vector.multi_reduction <add>, %253, %cst_33 [2] : vector<8x8x8xf32> to vector<8x8xf32>
    %255 = vector.shape_cast %254 : vector<8x8xf32> to vector<8x8x1xf32>
    %256 = tpu.reciprocal %255 {approx = true} : vector<8x8x1xf32> -> vector<8x8x1xf32>
    %257 = vector.broadcast %256 : vector<8x8x1xf32> to vector<8x8x8xf32>
    %258 = arith.mulf %253, %257 : vector<8x8x8xf32>
    "tpu.trace_start"() <{level = 10 : i32, message = "nqk,nkd->nqd"}> : () -> ()
    %cst_34 = arith.constant dense<0.000000e+00> : vector<8x8x8xf32>
    %259 = tpu.matmul %258, %245, %cst_34 {dimension_numbers = #tpu.dot_dimension_numbers<[2], [1], [1], [2], [0, 0, 0, 1, 1, 2], [0], [0]>} : vector<8x8x8xf32>, vector<8x8x8xf32>, vector<8x8x8xf32> -> vector<8x8x8xf32>
    "tpu.trace_stop"() : () -> ()
    %260 = vector.extract_strided_slice %259 {offsets = [0, 0, 0], sizes = [2, 8, 8], strides = [1, 1, 1]} : vector<8x8x8xf32> to vector<2x8x8xf32>
    %261 = vector.extract_strided_slice %259 {offsets = [2, 0, 0], sizes = [2, 8, 8], strides = [1, 1, 1]} : vector<8x8x8xf32> to vector<2x8x8xf32>
    %262 = vector.extract_strided_slice %259 {offsets = [4, 0, 0], sizes = [2, 8, 8], strides = [1, 1, 1]} : vector<8x8x8xf32> to vector<2x8x8xf32>
    %263 = vector.extract_strided_slice %259 {offsets = [6, 0, 0], sizes = [2, 8, 8], strides = [1, 1, 1]} : vector<8x8x8xf32> to vector<2x8x8xf32>
    %264 = tpu.concatenate %260, %261, %262, %263 in 2 : vector<2x8x8xf32>, vector<2x8x8xf32>, vector<2x8x8xf32>, vector<2x8x8xf32> -> vector<2x8x32xf32>
    %265 = vector.shape_cast %264 : vector<2x8x32xf32> to vector<16x32xf32>
    %cst_35 = arith.constant dense<0.000000e+00> : vector<16x128xf32>
    %266 = tpu.matmul %265, %4, %cst_35 {dimension_numbers = #tpu.dot_dimension_numbers<[1], [0], [0], [1], [0, 0, 1, 1], [], []>} : vector<16x32xf32>, vector<32x128xf32>, vector<16x128xf32> -> vector<16x128xf32>
    %267 = vector.broadcast %5 : vector<1x128xf32> to vector<16x128xf32>
    %268 = arith.addf %266, %267 : vector<16x128xf32>
    %c0_36 = arith.constant 0 : index
    %c0_37 = arith.constant 0 : index
    %269 = vector.load %arg2[%c0_36, %c0_37] : memref<16x128xf32, #tpu.memory_space<vmem>>, vector<16x128xf32>
    tpu.vector_store %arg2[%c0_36, %c0_37], %268 {strides = array<i32>} : memref<16x128xf32, #tpu.memory_space<vmem>>, vector<16x128xf32>,
    return
  }
}

</mosaic_0001>

<bundles_post_ra>
// kernel: bilstm_attn_forward.1
= control target key start
LH: loop header
LB: loop body
LE: loop exit
PB: predicated region body
PF: predicated region fallthrough
CT: control target
= control target key end

     0   :  { %s1918_s0 = inlined_call_operand.vmem [shape: f32[2,8,128], index: 0, kind: input, shape index: {}]   ;;  %s1919_s1 = inlined_call_operand.vmem [shape: f32[112,128], index: 1, kind: input, shape index: {}]   ;;  %s1920_s2 = inlined_call_operand.hbm [shape: f32[16,128], index: 2, kind: output, shape index: {}]  }
   0x1   :  { %v1536_v0 = vld [vmem:[%s1919_s1 + $0x18] sm:$0xff]  ;;  %v1541_v1 = vld [vmem:[%s1919_s1 + $0x10] sm:$0xff]  ;;  %v1548_v2 = vld [vmem:[%s1919_s1 + $0x8] sm:$0xff] }
   0x2   :  { %71 = vmatpush.msra.mxu0 %v1536_v0  ;;  %142 = vmatpush.msra.mxu1 %v1536_v0 }
   0x3   :  { %214 = vmatpush.msra.mxu3 %v1536_v0  ;;  %478 = vmatpush.msra.mxu2 %v1536_v0 }
   0x4   :  { %72 = vmatpush.msra.mxu0 %v1541_v1  ;;  %143 = vmatpush.msra.mxu1 %v1541_v1 }
   0x5   :  { %7 = vsyncpa [#allocation3], 0  ;;  %v1557_v3 = vld [vmem:[%s1919_s1] sm:$0xff]  ;;  %215 = vmatpush.msra.mxu3 %v1541_v1  ;;  %479 = vmatpush.msra.mxu2 %v1541_v1  ;;  %v1506_v4 = vmov 0.0   ;;  %v28_v5 = vlaneseq  ;;  %v1591_v8 = vld [vmem:[%s1918_s0 + $0x8] sm:$0xff]  ;;  %vm47_vm0 = vcmask 1041409  }
   0x6   :  { %73 = vmatpush.msra.mxu0 %v1548_v2  ;;  %144 = vmatpush.msra.mxu1 %v1548_v2  ;;  %v1586_v7 = vld [vmem:[%s1918_s0] sm:$0xff]  ;;  %v46_v10 = vrot.slane %v1591_v8, 7  ;;  %v51_v12 = vrot.slane %v1591_v8, 6  ;;  %s1507_s0 = smov 64   ;;  %s1508_s21 = smov 32   ;;  %vm55_vm6 = vcmask 261120  }
   0x7   :  { %216 = vmatpush.msra.mxu3 %v1548_v2  ;;  %480 = vmatpush.msra.mxu2 %v1548_v2  ;;  %v1581_v6 = vand.u32 127, %v28_v5  ;;  %v50_v11 = vrot.slane %v1586_v7, 7  ;;  %v117_v42 = vrot.slane %v1586_v7, 1  ;;  %v120_v43 = vrot.slane %v1586_v7, 6  ;;  %s1509_s4 = smov 112   ;;  %s1510_s5 = smov 120  }
   0x8   :  { %74 = vmatpush.msra.mxu0 %v1557_v3  ;;  %145 = vmatpush.msra.mxu1 %v1557_v3  ;;  %v1603_v14 = vsel %vm47_vm0, %v46_v10, %v1586_v7  ;;  %v121_v44 = vrot.slane %v1591_v8, 5  ;;  %s1511_s6 = smov 104   ;;  %s1512_s7 = smov 96  }
   0x9   :  { %75 = vmatmul.f32.vlgmr.msra.gmra.mxu0 %v1506_v4  ;;  %217 = vmatpush.msra.mxu3 %v1557_v3  ;;  %v34_v9 = vand.u32 31, %v1581_v6  ;;  %v1606_v15 = vsel %vm47_vm0, %v51_v12, %v50_v11  ;;  %v1625_v45 = vsel %vm47_vm0, %v1591_v8, %v117_v42  ;;  %s1513_s8 = smov 8   ;;  %s1514_s9 = smov 24  }
   0xa   :  { %350 = vmatpush.msrb.mxu0 %v1536_v0  ;;  %414 = vmatpush.msrb.mxu1 %v1536_v0  ;;  %v1628_v46 = vsel %vm47_vm0, %v121_v44, %v120_v43  ;;  %s1515_s10 = smov 16   ;;  %s1300_s24 = sshll.u32 %s1920_s2, 4  ;;  %s1301_s24 = int_to_ptr.hbm [resolvable:$true] %s1300_s24 }
   0xb   :  { %286 = vmatpush.msrb.mxu3 %v1536_v0  ;;  %481 = vmatpush.msra.mxu2 %v1557_v3  ;;  %vm1597_vm1 = vcmp.lt.s32.totalorder %v34_v9, 16  ;;  %s1517_s25 = smov 128  }
   0xc   :  { %351 = vmatpush.msrb.mxu0 %v1541_v1  ;;  %415 = vmatpush.msrb.mxu1 %v1541_v1  ;;  %v54_v16 = vsel %vm1597_vm1, %v1603_v14, %v1606_v15  ;;  %v124_v47 = vsel %vm1597_vm1, %v1625_v45, %v1628_v46 }
   0xd   :  { %287 = vmatpush.msrb.mxu3 %v1541_v1 }
   0xe   :  { %352 = vmatpush.msrb.mxu0 %v1548_v2  ;;  %416 = vmatpush.msrb.mxu1 %v1548_v2 }
   0xf   :  { %288 = vmatpush.msrb.mxu3 %v1548_v2 }
  0x10   :  { %353 = vmatpush.msrb.mxu0 %v1557_v3  ;;  %417 = vmatpush.msrb.mxu1 %v1557_v3 }
  0x11   :  { %289 = vmatpush.msrb.mxu3 %v1557_v3 }
  0x86   :  { %v76_v17 = vpop.f32.mrf.mxu0 }
  0x87   :  { %v79_v18 = vadd.f32 %v76_v17, %v54_v16 }
  0x89   :  { %1384 = vtanh.f32 %v79_v18  ;;  %v1312_v20 = vmul.f32 -1.442695, %v79_v18 }
  0x8b   :  { %1386 = vpow2.f32 %v1312_v20  ;;  %v189_v20 = vrot.slane %v1591_v8, 1 }
  0x8f   :  { %v1385_v19 = vpop.eup %1384 }
  0x90   :  { %102 = vrot.lane.b32.xlu0 %v1385_v19, %s1507_s0  ;;  %v188_v19 = vrot.slane %v1586_v7, 2 }
  0x91   :  { %v1387_v21 = vpop.eup %1386 }
  0x92   :  { %v83_v22 = vadd.f32 1.0, %v1387_v21  ;;  %v192_v21 = vrot.slane %v1586_v7, 5 }
  0x94   :  { %1388 = vrcp.f32 %v83_v22  ;;  %v95_v28 = vand.u32 2147483648, %v83_v22  ;;  %vm89_vm3 = vweird.f32 %v83_v22  ;;  %v93_v29 = vand.u32 2147483647, %v83_v22 }
  0x96   :  { %v96_v31 = vor.u32 1.1754944e-38, %v95_v28  ;;  %vm94_vm5 = vcmp.eq.f32.partialorder %v93_v29, 8.507059e+37 }
  0x9a   :  { %v1389_v23 = vpop.eup %1388 }
  0x9b   :  { %v85_v24 = vmul.f32 %v1389_v23, %v83_v22  ;;  %vm90_vm2 = vweird.f32 %v1389_v23  ;;  %v193_v22 = vrot.slane %v1591_v8, 4 }
  0x9c   :  { %vm91_vm4 = vmor %vm89_vm3, %vm90_vm2 }
  0x9d   :  { %v86_v25 = vsub.f32 1.0, %v85_v24  ;;  %v1654_v24 = vsel %vm47_vm0, %v193_v22, %v192_v21 }
  0x9f   :  { %v87_v26 = vmul.f32 %v1389_v23, %v86_v25 }
  0xa1   :  { %v88_v27 = vadd.f32 %v1389_v23, %v87_v26 }
  0xa3   :  { %v92_v30 = vsel %vm91_vm4, %v1389_v23, %v88_v27  ;;  %v1651_v23 = vsel %vm47_vm0, %v189_v20, %v188_v19 }
  0xa4   :  { %v97_v33 = vsel %vm94_vm5, %v96_v31, %v92_v30 }
  0xa5   :  { %v100_v35 = vmul.f32 0.0, %v97_v33 }
 0x102   :  { %v103_v32 = vpop.permute.xlu0 %102 }
 0x103   :  { %v105_v34 = vmul.f32 %v103_v32, %v97_v33 }
 0x105   :  { %107 = vrot.lane.b32.xlu0 %v105_v34, %s1508_s21 }
 0x177   :  { %v108_v36 = vpop.permute.xlu0 %107 }
 0x178   :  { %v110_v37 = vadd.f32 %v108_v36, %v100_v35 }
 0x17a   :  { %1390 = vtanh.f32 %v110_v37 }
 0x180   :  { %v1391_v38 = vpop.eup %1390 }
 0x181   :  { %113 = vrot.lane.b32.xlu1 %v1391_v38, %s1507_s0 }
 0x1f3   :  { %v114_v39 = vpop.permute.xlu1 %113 }
 0x1f4   :  { %v116_v40 = vmul.f32 %v114_v39, %v97_v33 }
 0x1f6   :  { %126 = vrot.lane.b32.xlu1 %v116_v40, %s1508_s21 }
 0x268   :  { %v1616_v41 = vpop.permute.xlu1 %126 }
 0x269   :  { %1313 = vmatmul.msk.f32.vlgmr.msra.gmra.mxu1 %vm55_vm6, %v1616_v41 }
 0x2e6   :  { %v147_v48 = vpop.f32.mrf.mxu1 }
 0x2e7   :  { %v150_v49 = vadd.f32 %v147_v48, %v124_v47 }
 0x2e9   :  { %1392 = vtanh.f32 %v150_v49  ;;  %v1314_v51 = vmul.f32 -1.442695, %v150_v49 }
 0x2eb   :  { %1394 = vpow2.f32 %v1314_v51  ;;  %v261_v51 = vrot.slane %v1591_v8, 2 }
 0x2ef   :  { %v1393_v50 = vpop.eup %1392 }
 0x2f0   :  { %173 = vrot.lane.b32.xlu2 %v1393_v50, %s1507_s0  ;;  %v260_v50 = vrot.slane %v1586_v7, 3 }
 0x2f1   :  { %v1395_v52 = vpop.eup %1394 }
 0x2f2   :  { %v154_v53 = vadd.f32 1.0, %v1395_v52  ;;  %v264_v52 = vrot.slane %v1586_v7, 4 }
 0x2f4   :  { %1396 = vrcp.f32 %v154_v53  ;;  %v166_v59 = vand.u32 2147483648, %v154_v53  ;;  %vm160_vm8 = vweird.f32 %v154_v53  ;;  %v164_v60 = vand.u32 2147483647, %v154_v53 }
 0x2f6   :  { %v167_v62 = vor.u32 1.1754944e-38, %v166_v59  ;;  %vm165_vm10 = vcmp.eq.f32.partialorder %v164_v60, 8.507059e+37 }
 0x2fa   :  { %v1397_v54 = vpop.eup %1396 }
 0x2fb   :  { %v156_v55 = vmul.f32 %v1397_v54, %v154_v53  ;;  %vm161_vm7 = vweird.f32 %v1397_v54  ;;  %v265_v53 = vrot.slane %v1591_v8, 3 }
 0x2fc   :  { %vm162_vm9 = vmor %vm160_vm8, %vm161_vm7 }
 0x2fd   :  { %v157_v56 = vsub.f32 1.0, %v156_v55  ;;  %v266_v55 = vsel %vm47_vm0, %v265_v53, %v264_v52 }
 0x2ff   :  { %v158_v57 = vmul.f32 %v1397_v54, %v157_v56 }
 0x301   :  { %v159_v58 = vadd.f32 %v1397_v54, %v158_v57 }
 0x303   :  { %v163_v61 = vsel %vm162_vm9, %v1397_v54, %v159_v58  ;;  %v262_v54 = vsel %vm47_vm0, %v261_v51, %v260_v50 }
 0x304   :  { %v168_v4 = vsel %vm165_vm10, %v167_v62, %v163_v61  ;;  %v268_v56 = vsel %vm1597_vm1, %v262_v54, %v266_v55 }
 0x305   :  { %v171_v9 = vmul.f32 %v168_v4, %v110_v37 }
 0x34a   :  { %v174_v63 = vpop.permute.xlu2 %173 }
 0x34b   :  { %v176_v5 = vmul.f32 %v174_v63, %v168_v4 }
 0x34d   :  { %178 = vrot.lane.b32.xlu2 %v176_v5, %s1508_s21 }
 0x3a7   :  { %v179_v10 = vpop.permute.xlu2 %178 }
 0x3a8   :  { %v181_v11 = vadd.f32 %v179_v10, %v171_v9 }
 0x3aa   :  { %1398 = vtanh.f32 %v181_v11 }
 0x3b0   :  { %v1399_v12 = vpop.eup %1398 }
 0x3b1   :  { %184 = vrot.lane.b32.xlu0 %v1399_v12, %s1507_s0 }
 0x423   :  { %v185_v16 = vpop.permute.xlu0 %184 }
 0x424   :  { %v187_v17 = vmul.f32 %v185_v16, %v168_v4 }
 0x426   :  { %198 = vrot.lane.b32.xlu1 %v187_v17, %s1508_s21 }
 0x498   :  { %v1638_v18 = vpop.permute.xlu1 %198 }
 0x499   :  { %1315 = vmatmul.msk.f32.vlgmr.msra.gmra.mxu3 %vm55_vm6, %v1638_v18 }
 0x49a   :  { %542 = vmatpush.msra.mxu3 %v1536_v0  ;;  %v196_v0 = vsel %vm1597_vm1, %v1651_v23, %v1654_v24 }
 0x49c   :  { %543 = vmatpush.msra.mxu3 %v1541_v1 }
 0x49e   :  { %544 = vmatpush.msra.mxu3 %v1548_v2 }
 0x4a0   :  { %545 = vmatpush.msra.mxu3 %v1557_v3 }
 0x51c   :  { %v219_v1 = vpop.f32.mrf.mxu3 }
 0x51d   :  { %v222_v2 = vadd.f32 %v219_v1, %v196_v0 }
 0x51f   :  { %1400 = vtanh.f32 %v222_v2  ;;  %v1316_v25 = vmul.f32 -1.442695, %v222_v2 }
 0x521   :  { %1402 = vpow2.f32 %v1316_v25  ;;  %v332_v25 = vsel %vm1597_vm1, %v266_v55, %v262_v54  ;;  %v396_v55 = vsel %vm1597_vm1, %v1654_v24, %v1651_v23 }
 0x525   :  { %v1401_v3 = vpop.eup %1400 }
 0x526   :  { %245 = vrot.lane.b32.xlu2 %v1401_v3, %s1507_s0 }
 0x527   :  { %v1403_v26 = vpop.eup %1402 }
 0x528   :  { %v226_v27 = vadd.f32 1.0, %v1403_v26 }
 0x52a   :  { %1404 = vrcp.f32 %v226_v27  ;;  %v238_v33 = vand.u32 2147483648, %v226_v27  ;;  %vm232_vm12 = vweird.f32 %v226_v27  ;;  %v236_v34 = vand.u32 2147483647, %v226_v27 }
 0x52c   :  { %v239_v36 = vor.u32 1.1754944e-38, %v238_v33  ;;  %vm237_vm14 = vcmp.eq.f32.partialorder %v236_v34, 8.507059e+37 }
 0x530   :  { %v1405_v28 = vpop.eup %1404 }
 0x531   :  { %v228_v29 = vmul.f32 %v1405_v28, %v226_v27  ;;  %vm233_vm11 = vweird.f32 %v1405_v28 }
 0x532   :  { %vm234_vm13 = vmor %vm232_vm12, %vm233_vm11 }
 0x533   :  { %v229_v30 = vsub.f32 1.0, %v228_v29 }
 0x535   :  { %v230_v31 = vmul.f32 %v1405_v28, %v229_v30 }
 0x537   :  { %v231_v32 = vadd.f32 %v1405_v28, %v230_v31 }
 0x539   :  { %v235_v35 = vsel %vm234_vm13, %v1405_v28, %v231_v32 }
 0x53a   :  { %v240_v38 = vsel %vm237_vm14, %v239_v36, %v235_v35 }
 0x53b   :  { %v243_v40 = vmul.f32 %v240_v38, %v181_v11 }
 0x580   :  { %v246_v37 = vpop.permute.xlu2 %245 }
 0x581   :  { %v248_v39 = vmul.f32 %v246_v37, %v240_v38 }
 0x583   :  { %250 = vrot.lane.b32.xlu0 %v248_v39, %s1508_s21 }
 0x5f5   :  { %v251_v42 = vpop.permute.xlu0 %250 }
 0x5f6   :  { %v253_v43 = vadd.f32 %v251_v42, %v243_v40 }
 0x5f8   :  { %1406 = vtanh.f32 %v253_v43 }
 0x5fe   :  { %v1407_v44 = vpop.eup %1406 }
 0x5ff   :  { %256 = vrot.lane.b32.xlu1 %v1407_v44, %s1507_s0 }
 0x671   :  { %v257_v47 = vpop.permute.xlu1 %256 }
 0x672   :  { %v259_v48 = vmul.f32 %v257_v47, %v240_v38 }
 0x674   :  { %270 = vrot.lane.b32.xlu2 %v259_v48, %s1508_s21 }
 0x6ce   :  { %v1664_v49 = vpop.permute.xlu2 %270 }
 0x6cf   :  { %1317 = vmatmul.msk.f32.vlgmr.msrb.gmra.mxu3 %vm55_vm6, %v1664_v49 }
 0x752   :  { %v291_v57 = vpop.f32.mrf.mxu3 }
 0x753   :  { %v294_v58 = vadd.f32 %v291_v57, %v268_v56 }
 0x755   :  { %1408 = vtanh.f32 %v294_v58  ;;  %v1318_v60 = vmul.f32 -1.442695, %v294_v58 }
 0x757   :  { %1410 = vpow2.f32 %v1318_v60 }
 0x75b   :  { %v1409_v59 = vpop.eup %1408 }
 0x75c   :  { %317 = vrot.lane.b32.xlu0 %v1409_v59, %s1507_s0 }
 0x75d   :  { %v1411_v61 = vpop.eup %1410 }
 0x75e   :  { %v298_v62 = vadd.f32 1.0, %v1411_v61 }
 0x760   :  { %1412 = vrcp.f32 %v298_v62  ;;  %v310_v9 = vand.u32 2147483648, %v298_v62  ;;  %vm304_vm0 = vweird.f32 %v298_v62  ;;  %v308_v10 = vand.u32 2147483647, %v298_v62 }
 0x762   :  { %v311_v12 = vor.u32 1.1754944e-38, %v310_v9  ;;  %vm309_vm3 = vcmp.eq.f32.partialorder %v308_v10, 8.507059e+37 }
 0x766   :  { %v1413_v7 = vpop.eup %1412 }
 0x767   :  { %v300_v8 = vmul.f32 %v1413_v7, %v298_v62  ;;  %vm305_vm15 = vweird.f32 %v1413_v7 }
 0x768   :  { %vm306_vm2 = vmor %vm304_vm0, %vm305_vm15 }
 0x769   :  { %v301_v63 = vsub.f32 1.0, %v300_v8 }
 0x76b   :  { %v302_v4 = vmul.f32 %v1413_v7, %v301_v63 }
 0x76d   :  { %v303_v5 = vadd.f32 %v1413_v7, %v302_v4 }
 0x76f   :  { %v307_v11 = vsel %vm306_vm2, %v1413_v7, %v303_v5 }
 0x770   :  { %v312_v17 = vsel %vm309_vm3, %v311_v12, %v307_v11 }
 0x771   :  { %v315_v20 = vmul.f32 %v312_v17, %v253_v43 }
 0x7ce   :  { %v318_v16 = vpop.permute.xlu0 %317 }
 0x7cf   :  { %v320_v19 = vmul.f32 %v318_v16, %v312_v17 }
 0x7d1   :  { %322 = vrot.lane.b32.xlu1 %v320_v19, %s1508_s21 }
 0x843   :  { %v323_v21 = vpop.permute.xlu1 %322 }
 0x844   :  { %v325_v22 = vadd.f32 %v323_v21, %v315_v20 }
 0x846   :  { %1414 = vtanh.f32 %v325_v22 }
 0x84c   :  { %v1415_v0 = vpop.eup %1414 }
 0x84d   :  { %328 = vrot.lane.b32.xlu2 %v1415_v0, %s1507_s0 }
 0x8a7   :  { %v329_v1 = vpop.permute.xlu2 %328 }
 0x8a8   :  { %v331_v2 = vmul.f32 %v329_v1, %v312_v17  ;;  %v460_v1 = vsel %vm1597_vm1, %v1628_v46, %v1625_v45 }
 0x8aa   :  { %334 = vrot.lane.b32.xlu0 %v331_v2, %s1508_s21 }
 0x91c   :  { %v1680_v3 = vpop.permute.xlu0 %334 }
 0x91d   :  { %1319 = vmatmul.msk.f32.vlgmr.msrb.gmra.mxu0 %vm55_vm6, %v1680_v3 }
 0x99a   :  { %v355_v26 = vpop.f32.mrf.mxu0 }
 0x99b   :  { %v358_v27 = vadd.f32 %v355_v26, %v332_v25 }
 0x99d   :  { %1416 = vtanh.f32 %v358_v27  ;;  %v1320_v29 = vmul.f32 -1.442695, %v358_v27 }
 0x99f   :  { %1418 = vpow2.f32 %v1320_v29 }
 0x9a3   :  { %v1417_v28 = vpop.eup %1416 }
 0x9a4   :  { %381 = vrot.lane.b32.xlu1 %v1417_v28, %s1507_s0 }
 0x9a5   :  { %v1419_v30 = vpop.eup %1418 }
 0x9a6   :  { %v362_v31 = vadd.f32 1.0, %v1419_v30 }
 0x9a8   :  { %1420 = vrcp.f32 %v362_v31  ;;  %v374_v37 = vand.u32 2147483648, %v362_v31  ;;  %vm368_vm5 = vweird.f32 %v362_v31  ;;  %v372_v38 = vand.u32 2147483647, %v362_v31 }
 0x9aa   :  { %v375_v40 = vor.u32 1.1754944e-38, %v374_v37  ;;  %vm373_vm8 = vcmp.eq.f32.partialorder %v372_v38, 8.507059e+37 }
 0x9ae   :  { %v1421_v32 = vpop.eup %1420 }
 0x9af   :  { %v364_v33 = vmul.f32 %v1421_v32, %v362_v31  ;;  %vm369_vm4 = vweird.f32 %v1421_v32 }
 0x9b0   :  { %vm370_vm7 = vmor %vm368_vm5, %vm369_vm4  ;;  %vm43_vm5 = vcmp.lt.s32.totalorder %v1581_v6, 16 }
 0x9b1   :  { %v365_v34 = vsub.f32 1.0, %v364_v33 }
 0x9b3   :  { %v366_v35 = vmul.f32 %v1421_v32, %v365_v34 }
 0x9b5   :  { %v367_v36 = vadd.f32 %v1421_v32, %v366_v35 }
 0x9b7   :  { %v371_v39 = vsel %vm370_vm7, %v1421_v32, %v367_v36  ;;  %vm652_vm7 = vcmask 1040384  }
 0x9b8   :  { %v376_v43 = vsel %vm373_vm8, %v375_v40, %v371_v39  ;;  %vm655_vm8 = vcmask 1041408  }
 0x9b9   :  { %v379_v47 = vmul.f32 %v376_v43, %v325_v22 }
 0xa16   :  { %v382_v42 = vpop.permute.xlu1 %381 }
 0xa17   :  { %v384_v44 = vmul.f32 %v382_v42, %v376_v43 }
 0xa19   :  { %386 = vrot.lane.b32.xlu2 %v384_v44, %s1508_s21 }
 0xa73   :  { %v387_v48 = vpop.permute.xlu2 %386 }
 0xa74   :  { %v389_v50 = vadd.f32 %v387_v48, %v379_v47 }
 0xa76   :  { %1422 = vtanh.f32 %v389_v50 }
 0xa7c   :  { %v1423_v51 = vpop.eup %1422 }
 0xa7d   :  { %392 = vrot.lane.b32.xlu0 %v1423_v51, %s1507_s0  ;;  %v524_v51 = vsel %vm1597_vm1, %v1606_v15, %v1603_v14 }
 0xaef   :  { %v393_v52 = vpop.permute.xlu0 %392 }
 0xaf0   :  { %v395_v53 = vmul.f32 %v393_v52, %v376_v43 }
 0xaf2   :  { %398 = vrot.lane.b32.xlu1 %v395_v53, %s1508_s21 }
 0xb64   :  { %v1690_v54 = vpop.permute.xlu1 %398 }
 0xb65   :  { %1321 = vmatmul.msk.f32.vlgmr.msrb.gmra.mxu1 %vm55_vm6, %v1690_v54 }
 0xbe2   :  { %v419_v56 = vpop.f32.mrf.mxu1 }
 0xbe3   :  { %v422_v57 = vadd.f32 %v419_v56, %v396_v55 }
 0xbe5   :  { %1424 = vtanh.f32 %v422_v57  ;;  %v1322_v59 = vmul.f32 -1.442695, %v422_v57 }
 0xbe7   :  { %1426 = vpow2.f32 %v1322_v59 }
 0xbeb   :  { %v1425_v58 = vpop.eup %1424 }
 0xbec   :  { %445 = vrot.lane.b32.xlu2 %v1425_v58, %s1507_s0 }
 0xbed   :  { %v1427_v60 = vpop.eup %1426 }
 0xbee   :  { %v426_v61 = vadd.f32 1.0, %v1427_v60 }
 0xbf0   :  { %1428 = vrcp.f32 %v426_v61  ;;  %v438_v5 = vand.u32 2147483648, %v426_v61  ;;  %vm432_vm10 = vweird.f32 %v426_v61  ;;  %v436_v23 = vand.u32 2147483647, %v426_v61 }
 0xbf2   :  { %v439_v9 = vor.u32 1.1754944e-38, %v438_v5  ;;  %vm437_vm12 = vcmp.eq.f32.partialorder %v436_v23, 8.507059e+37 }
 0xbf6   :  { %v1429_v62 = vpop.eup %1428 }
 0xbf7   :  { %v428_v7 = vmul.f32 %v1429_v62, %v426_v61  ;;  %vm433_vm9 = vweird.f32 %v1429_v62 }
 0xbf8   :  { %vm434_vm11 = vmor %vm432_vm10, %vm433_vm9  ;;  %vm658_vm9 = vcmask 1042432   ;;  %vm661_vm10 = vcmask 1043456  }
 0xbf9   :  { %v429_v8 = vsub.f32 1.0, %v428_v7 }
 0xbfb   :  { %v430_v63 = vmul.f32 %v1429_v62, %v429_v8 }
 0xbfd   :  { %v431_v4 = vadd.f32 %v1429_v62, %v430_v63 }
 0xbff   :  { %v435_v24 = vsel %vm434_vm11, %v1429_v62, %v431_v4  ;;  %vm664_vm11 = vcmask 1044480  }
 0xc00   :  { %v440_v11 = vsel %vm437_vm12, %v439_v9, %v435_v24  ;;  %vm667_vm12 = vcmask 1045504  }
 0xc01   :  { %v443_v16 = vmul.f32 %v440_v11, %v389_v50 }
 0xc46   :  { %v446_v10 = vpop.permute.xlu2 %445 }
 0xc47   :  { %v448_v12 = vmul.f32 %v446_v10, %v440_v11 }
 0xc49   :  { %450 = vrot.lane.b32.xlu0 %v448_v12, %s1508_s21 }
 0xcbb   :  { %v451_v17 = vpop.permute.xlu0 %450 }
 0xcbc   :  { %v453_v19 = vadd.f32 %v451_v17, %v443_v16  ;;  %v21_v16 = vld [vmem:[%s1919_s1 + $0x38] sm:$0xff]  ;;  %v20_v17 = vld [vmem:[%s1919_s1 + $0x30] sm:$0xff] }
 0xcbd   :  { %692 = vmatpush.msra.mxu0 %v21_v16 }
 0xcbe   :  { %1430 = vtanh.f32 %v453_v19 }
 0xcbf   :  { %693 = vmatpush.msra.mxu0 %v20_v17 }
 0xcc4   :  { %v1431_v20 = vpop.eup %1430 }
 0xcc5   :  { %456 = vrot.lane.b32.xlu1 %v1431_v20, %s1507_s0  ;;  %v18_v20 = vld [vmem:[%s1919_s1 + $0x20] sm:$0xff] }
 0xd37   :  { %v457_v21 = vpop.permute.xlu1 %456 }
 0xd38   :  { %v459_v22 = vmul.f32 %v457_v21, %v440_v11  ;;  %v602_v21 = vsel %vm43_vm5, %v1680_v3, %v1690_v54 }
 0xd3a   :  { %462 = vrot.lane.b32.xlu2 %v459_v22, %s1508_s21  ;;  %v603_v22 = vsel %vm43_vm5, %v1690_v54, %v1680_v3 }
 0xd3b   :  { %v636_v54 = vperm.slane %v603_v22, 0 }
 0xd94   :  { %v1702_v0 = vpop.permute.xlu2 %462 }
 0xd95   :  { %1323 = vmatmul.msk.f32.vlgmr.msra.gmra.mxu2 %vm55_vm6, %v1702_v0 }
 0xe18   :  { %v483_v2 = vpop.f32.mrf.mxu2 }
 0xe19   :  { %v486_v25 = vadd.f32 %v483_v2, %v460_v1  ;;  %v615_v1 = vrot.slane %v602_v21, 1 }
 0xe1b   :  { %1432 = vtanh.f32 %v486_v25  ;;  %v1324_v27 = vmul.f32 -1.442695, %v486_v25  ;;  %v617_v25 = vrot.slane %v603_v22, 1  ;;  %v633_v3 = vperm.slane %v615_v1, 0 }
 0xe1d   :  { %1434 = vpow2.f32 %v1324_v27  ;;  %v604_v27 = vsel %vm43_vm5, %v1702_v0, %v1664_v49 }
 0xe21   :  { %v1433_v26 = vpop.eup %1432 }
 0xe22   :  { %509 = vrot.lane.b32.xlu0 %v1433_v26, %s1507_s0  ;;  %v599_v26 = vsel %vm43_vm5, %v1664_v49, %v1702_v0 }
 0xe23   :  { %v1435_v28 = vpop.eup %1434 }
 0xe24   :  { %v490_v29 = vadd.f32 1.0, %v1435_v28  ;;  %v632_v28 = vperm.slane %v602_v21, 0 }
 0xe26   :  { %1436 = vrcp.f32 %v490_v29  ;;  %v502_v35 = vand.u32 2147483648, %v490_v29  ;;  %vm496_vm14 = vweird.f32 %v490_v29  ;;  %v500_v45 = vand.u32 2147483647, %v490_v29 }
 0xe28   :  { %v503_v36 = vor.u32 1.1754944e-38, %v502_v35  ;;  %vm501_vm0 = vcmp.eq.f32.partialorder %v500_v45, 8.507059e+37  ;;  %v628_v35 = vperm.slane %v599_v26, 0 }
 0xe2c   :  { %v1437_v30 = vpop.eup %1436 }
 0xe2d   :  { %v492_v31 = vmul.f32 %v1437_v30, %v490_v29  ;;  %vm497_vm13 = vweird.f32 %v1437_v30 }
 0xe2e   :  { %vm498_vm15 = vmor %vm496_vm14, %vm497_vm13  ;;  %vm670_vm13 = vcmask 1046528   ;;  %vm719_vm14 = vcmask 64512  }
 0xe2f   :  { %v493_v32 = vsub.f32 1.0, %v492_v31  ;;  %v637_v31 = vperm.slane %v617_v25, 0 }
 0xe31   :  { %v494_v33 = vmul.f32 %v1437_v30, %v493_v32  ;;  %v619_v32 = vrot.slane %v604_v27, 1 }
 0xe33   :  { %v495_v34 = vadd.f32 %v1437_v30, %v494_v33 }
 0xe35   :  { %v499_v46 = vsel %vm498_vm15, %v1437_v30, %v495_v34  ;;  %v613_v30 = vrot.slane %v599_v26, 1  ;;  %vm1256_vm15 = vcmask 130048  }
 0xe36   :  { %v504_v38 = vsel %vm501_vm0, %v503_v36, %v499_v46  ;;  %vm1259_vm0 = vcmask 195584  }
 0xe37   :  { %v507_v40 = vmul.f32 %v504_v38, %v453_v19  ;;  %v19_v19 = vld [vmem:[%s1919_s1 + $0x28] sm:$0xff] }
 0xe38   :  { %694 = vmatpush.msra.mxu0 %v19_v19 }
 0xe3a   :  { %695 = vmatpush.msra.mxu0 %v18_v20 }
 0xe94   :  { %v510_v37 = vpop.permute.xlu0 %509 }
 0xe95   :  { %v512_v39 = vmul.f32 %v510_v37, %v504_v38  ;;  %v629_v37 = vperm.slane %v613_v30, 0 }
 0xe97   :  { %514 = vrot.lane.b32.xlu1 %v512_v39, %s1508_s21 }
 0xf09   :  { %v515_v42 = vpop.permute.xlu1 %514 }
 0xf0a   :  { %v517_v43 = vadd.f32 %v515_v42, %v507_v40  ;;  %v640_v40 = vperm.slane %v604_v27, 0 }
 0xf0c   :  { %1438 = vtanh.f32 %v517_v43 }
 0xf12   :  { %v1439_v44 = vpop.eup %1438 }
 0xf13   :  { %520 = vrot.lane.b32.xlu2 %v1439_v44, %s1507_s0 }
 0xf6d   :  { %v521_v47 = vpop.permute.xlu2 %520 }
 0xf6e   :  { %v523_v48 = vmul.f32 %v521_v47, %v504_v38 }
 0xf70   :  { %526 = vrot.lane.b32.xlu0 %v523_v48, %s1508_s21 }
 0xfe2   :  { %v1714_v50 = vpop.permute.xlu0 %526 }
 0xfe3   :  { %1325 = vmatmul.msk.f32.vlgmr.msra.gmra.mxu3 %vm55_vm6, %v1714_v50  ;;  %v596_v2 = vsel %vm43_vm5, %v1638_v18, %v1714_v50  ;;  %v605_v45 = vsel %vm43_vm5, %v1714_v50, %v1638_v18 }
 0xfe4   :  { %v611_v29 = vrot.slane %v596_v2, 1  ;;  %v624_v33 = vperm.slane %v596_v2, 0 }
 0xfe6   :  { %v625_v0 = vperm.slane %v611_v29, 0 }
0x1066   :  { %v547_v52 = vpop.f32.mrf.mxu3 }
0x1067   :  { %v550_v53 = vadd.f32 %v547_v52, %v524_v51 }
0x1069   :  { %1440 = vtanh.f32 %v550_v53  ;;  %v1326_v56 = vmul.f32 -1.442695, %v550_v53  ;;  %v641_v53 = vperm.slane %v619_v32, 0 }
0x106b   :  { %1442 = vpow2.f32 %v1326_v56 }
0x106f   :  { %v1441_v55 = vpop.eup %1440 }
0x1070   :  { %573 = vrot.lane.b32.xlu1 %v1441_v55, %s1507_s0 }
0x1071   :  { %v1443_v57 = vpop.eup %1442 }
0x1072   :  { %v554_v58 = vadd.f32 1.0, %v1443_v57 }
0x1074   :  { %1444 = vrcp.f32 %v554_v58  ;;  %v566_v8 = vand.u32 2147483648, %v554_v58  ;;  %vm560_vm3 = vweird.f32 %v554_v58  ;;  %v564_v13 = vand.u32 2147483647, %v554_v58 }
0x1076   :  { %v567_v15 = vor.u32 1.1754944e-38, %v566_v8  ;;  %vm565_vm4 = vcmp.eq.f32.partialorder %v564_v13, 8.507059e+37 }
0x107a   :  { %v1445_v59 = vpop.eup %1444 }
0x107b   :  { %v556_v60 = vmul.f32 %v1445_v59, %v554_v58  ;;  %vm561_vm2 = vweird.f32 %v1445_v59 }
0x107c   :  { %vm562_vm1 = vmor %vm560_vm3, %vm561_vm2 }
0x107d   :  { %v557_v61 = vsub.f32 1.0, %v556_v60 }
0x107f   :  { %v558_v62 = vmul.f32 %v1445_v59, %v557_v61 }
0x1081   :  { %v559_v7 = vadd.f32 %v1445_v59, %v558_v62  ;;  %v1382_v62 = vld [vmem:[%s1919_s1 + $0x40] ss:$0 sm:$0xff] }
0x1083   :  { %v563_v14 = vsel %vm562_vm1, %v1445_v59, %v559_v7 }
0x1084   :  { %v568_v4 = vsel %vm565_vm4, %v567_v15, %v563_v14 }
0x1085   :  { %v571_v23 = vmul.f32 %v568_v4, %v517_v43  ;;  %v644_v43 = vperm.slane %v605_v45, 0 }
0x10e2   :  { %v574_v63 = vpop.permute.xlu1 %573 }
0x10e3   :  { %v576_v5 = vmul.f32 %v574_v63, %v568_v4 }
0x10e5   :  { %578 = vrot.lane.b32.xlu2 %v576_v5, %s1508_s21 }
0x113f   :  { %v579_v24 = vpop.permute.xlu2 %578 }
0x1140   :  { %v581_v9 = vadd.f32 %v579_v24, %v571_v23 }
0x1142   :  { %1446 = vtanh.f32 %v581_v9 }
0x1148   :  { %v1447_v10 = vpop.eup %1446 }
0x1149   :  { %584 = vrot.lane.b32.xlu0 %v1447_v10, %s1507_s0 }
0x11bb   :  { %v585_v11 = vpop.permute.xlu0 %584 }
0x11bc   :  { %v587_v12 = vmul.f32 %v585_v11, %v568_v4 }
0x11be   :  { %590 = vrot.lane.b32.xlu1 %v587_v12, %s1508_s21 }
0x1230   :  { %v591_v34 = vpop.permute.xlu1 %590 }
0x1231   :  { %v593_v49 = vsel %vm43_vm5, %v1616_v41, %v591_v34  ;;  %v606_v38 = vsel %vm43_vm5, %v591_v34, %v1616_v41  ;;  %v621_v41 = vrot.slane %v605_v45, 1 }
0x1232   :  { %v608_v46 = vrot.slane %v593_v49, 1  ;;  %v653_v36 = vsel %vm652_vm7, %v593_v49, %v624_v33  ;;  %v648_v48 = vperm.slane %v606_v38, 0  ;;  %v623_v56 = vrot.slane %v606_v38, 1 }
0x1233   :  { %v656_v39 = vsel %vm655_vm8, %v653_v36, %v628_v35  ;;  %v645_v58 = vperm.slane %v621_v41, 0 }
0x1234   :  { %v654_v18 = vsel %vm652_vm7, %v608_v46, %v625_v0  ;;  %v659_v42 = vsel %vm658_vm9, %v656_v39, %v632_v28  ;;  %v649_v60 = vperm.slane %v623_v56, 0 }
0x1235   :  { %v657_v44 = vsel %vm655_vm8, %v654_v18, %v629_v37  ;;  %v662_v47 = vsel %vm661_vm10, %v659_v42, %v636_v54 }
0x1236   :  { %v665_v50 = vsel %vm664_vm11, %v662_v47, %v640_v40  ;;  %v660_v6 = vsel %vm658_vm9, %v657_v44, %v633_v3 }
0x1237   :  { %v668_v51 = vsel %vm667_vm12, %v665_v50, %v644_v43  ;;  %v663_v52 = vsel %vm661_vm10, %v660_v6, %v637_v31 }
0x1238   :  { %v671_v55 = vsel %vm670_vm13, %v668_v51, %v648_v48  ;;  %v666_v57 = vsel %vm664_vm11, %v663_v52, %v641_v53 }
0x1239   :  { %1327 = vmatmul.msk.f32.vlgmr.msra.gmra.mxu0 %vm55_vm6, %v671_v55  ;;  %v669_v59 = vsel %vm667_vm12, %v666_v57, %v645_v58 }
0x123a   :  { %v672_v61 = vsel %vm670_vm13, %v669_v59, %v649_v60 }
0x1241   :  { %1328 = vmatmul.msk.f32.gmra.mxu0 %vm55_vm6, %v672_v61 }
0x12b6   :  { %v697_v7 = vpop.f32.mrf.mxu0 }
0x12b7   :  { %v1786_v8 = vadd.f32 %v1382_v62, %v697_v7 }
0x12b9   :  { %709 = vrot.lane.b32.xlu0 %v1786_v8, %s1509_s4  ;;  %705 = vrot.lane.b32.xlu2 %v1786_v8, %s1510_s5 }
0x12be   :  { %v700_v13 = vpop.f32.mrf.mxu0 }
0x12bf   :  { %v1790_v14 = vadd.f32 %v1382_v62, %v700_v13 }
0x12c1   :  { %713 = vrot.lane.b32.xlu0 %v1786_v8, %s1511_s6  ;;  %707 = vrot.lane.b32.xlu2 %v1790_v14, %s1510_s5 }
0x12c2   :  { %711 = vrot.lane.b32.xlu1 %v1790_v14, %s1509_s4 }
0x12c9   :  { %717 = vrot.lane.b32.xlu0 %v1786_v8, %s1512_s7  ;;  %744 = vrot.lane.b32.xlu2 %v1790_v14, %s1512_s7 }
0x12ca   :  { %715 = vrot.lane.b32.xlu1 %v1790_v14, %s1511_s6 }
0x1313   :  { %v1798_v15 = vpop.permute.xlu2 %705 }
0x1314   :  { %770 = vrot.lane.b32.xlu1 %v1798_v15, %s1512_s7  ;;  %v1367_v41 = vpack.i.bf16 %v1798_v15, %v1786_v8 }
0x131b   :  { %v1801_v63 = vpop.permute.xlu2 %707 }
0x131c   :  { %796 = vrot.lane.b32.xlu1 %v1801_v63, %s1512_s7 }
0x1323   :  { %v745_v4 = vpop.permute.xlu2 %744 }
0x1324   :  { %1331 = vmatpush.xpose.msk.msrb.mxu2 %vm719_vm14, %v745_v4 }
0x1327   :  { %1332 = vmatmul.msk.f32.vlgmr.msrb.gmra.mxu2 %vm719_vm14, %v1790_v14 }
0x132b   :  { %v1807_v5 = vpop.permute.xlu0 %709 }
0x132c   :  { %822 = vrot.lane.b32.xlu2 %v1807_v5, %s1512_s7 }
0x1333   :  { %v1810_v23 = vpop.permute.xlu0 %713 }
0x1334   :  { %v1812_v24 = vpop.permute.xlu1 %711  ;;  %874 = vrot.lane.b32.xlu2 %v1810_v23, %s1512_s7 }
0x1335   :  { %848 = vrot.lane.b32.xlu0 %v1812_v24, %s1512_s7 }
0x133b   :  { %v718_v9 = vpop.permute.xlu0 %717 }
0x133c   :  { %v1816_v10 = vpop.permute.xlu1 %715  ;;  %1329 = vmatpush.xpose.msk.msra.mxu1 %vm719_vm14, %v718_v9 }
0x133d   :  { %900 = vrot.lane.b32.xlu0 %v1816_v10, %s1512_s7 }
0x133f   :  { %1330 = vmatmul.msk.f32.vlgmr.msra.gmra.mxu1 %vm719_vm14, %v1786_v8 }
0x1386   :  { %v823_v11 = vpop.permute.xlu2 %822  ;;  %v771_v12 = vpop.permute.xlu1 %770 }
0x1387   :  { %1333 = vmatpush.xpose.msk.msrb.mxu3 %vm719_vm14, %v771_v12  ;;  %1337 = vmatpush.xpose.msk.msra.mxu2 %vm719_vm14, %v823_v11 }
0x138a   :  { %1334 = vmatmul.msk.f32.vlgmr.msrb.gmra.mxu3 %vm719_vm14, %v1798_v15  ;;  %1338 = vmatmul.msk.f32.vlgmr.msra.gmra.mxu2 %vm719_vm14, %v1807_v5 }
0x138e   :  { %v875_v16 = vpop.permute.xlu2 %874  ;;  %v797_v17 = vpop.permute.xlu1 %796 }
0x138f   :  { %1335 = vmatpush.xpose.msk.msrb.mxu1 %vm719_vm14, %v797_v17  ;;  %1341 = vmatpush.xpose.msk.msrb.mxu0 %vm719_vm14, %v875_v16 }
0x1392   :  { %1336 = vmatmul.msk.f32.vlgmr.msrb.gmra.mxu1 %vm719_vm14, %v1801_v63  ;;  %1342 = vmatmul.msk.f32.vlgmr.msrb.gmra.mxu0 %vm719_vm14, %v1810_v23 }
0x13a7   :  { %v849_v19 = vpop.permute.xlu0 %848 }
0x13a8   :  { %1339 = vmatpush.xpose.msk.msra.mxu3 %vm719_vm14, %v849_v19 }
0x13aa   :  { %v767_v20 = vpop.f32.mrf.mxu2 }
0x13ab   :  { %v927_v21 = vmul.f32 0.35355338, %v767_v20  ;;  %1340 = vmatmul.msk.f32.vlgmr.msra.gmra.mxu3 %vm719_vm14, %v1812_v24 }
0x13ad   :  { %v937_v22 = vsel %vm719_vm14, %v927_v21, -inf }
0x13ae   :  { %938 = vmax.xlane.f32.xlu0 %v937_v22 }
0x13af   :  { %v901_v1 = vpop.permute.xlu0 %900 }
0x13b0   :  { %1343 = vmatpush.xpose.msk.msra.mxu1 %vm719_vm14, %v901_v1 }
0x13b3   :  { %1344 = vmatmul.msk.f32.vlgmr.msra.gmra.mxu1 %vm719_vm14, %v1816_v10 }
0x13bc   :  { %v741_v2 = vpop.f32.mrf.mxu1 }
0x13bd   :  { %v926_v25 = vmul.f32 0.35355338, %v741_v2  ;;  %v1377_v2 = vpack.i.bf16 %v1810_v23, %v1801_v63 }
0x13bf   :  { %v934_v26 = vsel %vm719_vm14, %v926_v25, -inf }
0x13c0   :  { %935 = vmax.xlane.f32.xlu1 %v934_v26 }
0x140d   :  { %v793_v31 = vpop.f32.mrf.mxu3  ;;  %v845_v34 = vpop.f32.mrf.mxu2 }
0x140e   :  { %v928_v32 = vmul.f32 0.35355338, %v793_v31  ;;  %v930_v35 = vmul.f32 0.35355338, %v845_v34 }
0x140f   :  { %v819_v27 = vpop.f32.mrf.mxu1  ;;  %v897_v28 = vpop.f32.mrf.mxu0 }
0x1410   :  { %v929_v29 = vmul.f32 0.35355338, %v819_v27  ;;  %v932_v3 = vmul.f32 0.35355338, %v897_v28  ;;  %v940_v33 = vsel %vm719_vm14, %v928_v32, -inf  ;;  %v946_v45 = vsel %vm719_vm14, %v930_v35, -inf }
0x1412   :  { %v952_v54 = vsel %vm719_vm14, %v932_v3, -inf  ;;  %v943_v30 = vsel %vm719_vm14, %v929_v29, -inf }
0x1413   :  { %953 = vmax.xlane.f32.xlu2 %v952_v54  ;;  %944 = vmax.xlane.f32.xlu1 %v943_v30  ;;  %v1372_v30 = vpack.i.bf16 %v1807_v5, %v1790_v14 }
0x141b   :  { %941 = vmax.xlane.f32.xlu2 %v940_v33 }
0x1421   :  { %v939_v49 = vpop.xlane.xlu0 %938 }
0x1422   :  { %v959_v0 = vsub.f32 %v927_v21, %v939_v49 }
0x1423   :  { %947 = vmax.xlane.f32.xlu2 %v946_v45 }
0x1424   :  { %v968_v46 = vmul.f32 1.442695, %v959_v0 }
0x1426   :  { %1448 = vpow2.f32 %v968_v46 }
0x142c   :  { %v1848_v47 = vpop.eup %1448 }
0x142d   :  { %v985_v48 = vsel %vm719_vm14, %v1848_v47, 0.0 }
0x142e   :  { %v871_v36 = vpop.f32.mrf.mxu3 }
0x142f   :  { %v931_v37 = vmul.f32 0.35355338, %v871_v36 }
0x1430   :  { %v923_v38 = vpop.f32.mrf.mxu1 }
0x1431   :  { %v933_v39 = vmul.f32 0.35355338, %v923_v38  ;;  %v949_v40 = vsel %vm719_vm14, %v931_v37, -inf }
0x1432   :  { %950 = vmax.xlane.f32.xlu0 %v949_v40 }
0x1433   :  { %v955_v18 = vsel %vm719_vm14, %v933_v39, -inf  ;;  %v936_v42 = vpop.xlane.xlu1 %935 }
0x1434   :  { %956 = vmax.xlane.f32.xlu1 %v955_v18  ;;  %v958_v43 = vsub.f32 %v926_v25, %v936_v42 }
0x1436   :  { %v966_v44 = vmul.f32 1.442695, %v958_v43 }
0x1438   :  { %1450 = vpow2.f32 %v966_v44 }
0x143c   :  { %986 = vadd.xlane.f32.xlu1 %v985_v48 }
0x143e   :  { %v1451_v50 = vpop.eup %1450 }
0x143f   :  { %v982_v6 = vsel %vm719_vm14, %v1451_v50, 0.0 }
0x1440   :  { %983 = vadd.xlane.f32.xlu2 %v982_v6 }
0x1446   :  { %1368 = vrot.lane.b32.xlu0 %v1367_v41, %s1507_s0 }
0x1486   :  { %v954_v51 = vpop.xlane.xlu2 %953  ;;  %v945_v52 = vpop.xlane.xlu1 %944 }
0x1487   :  { %v964_v53 = vsub.f32 %v932_v3, %v954_v51  ;;  %v961_v55 = vsub.f32 %v929_v29, %v945_v52 }
0x1489   :  { %v978_v56 = vmul.f32 1.442695, %v964_v53  ;;  %v972_v57 = vmul.f32 1.442695, %v961_v55 }
0x148b   :  { %1452 = vpow2.f32 %v978_v56 }
0x148c   :  { %1454 = vpow2.f32 %v972_v57 }
0x148e   :  { %v942_v58 = vpop.xlane.xlu2 %941 }
0x148f   :  { %v960_v59 = vsub.f32 %v928_v32, %v942_v58 }
0x1491   :  { %v1856_v60 = vpop.eup %1452  ;;  %v970_v61 = vmul.f32 1.442695, %v960_v59 }
0x1492   :  { %v1858_v62 = vpop.eup %1454  ;;  %v1000_v7 = vsel %vm719_vm14, %v1856_v60, 0.0 }
0x1493   :  { %1456 = vpow2.f32 %v970_v61  ;;  %1001 = vadd.xlane.f32.xlu2 %v1000_v7  ;;  %v991_v8 = vsel %vm719_vm14, %v1858_v62, 0.0  ;;  %v26_v7 = vld [vmem:[%s1919_s1 + $0x60] sm:$0xff] }
0x1494   :  { %992 = vadd.xlane.f32.xlu1 %v991_v8  ;;  %v25_v8 = vld [vmem:[%s1919_s1 + $0x58] sm:$0xff] }
0x1496   :  { %v948_v13 = vpop.xlane.xlu2 %947 }
0x1497   :  { %v962_v15 = vsub.f32 %v930_v35, %v948_v13  ;;  %v24_v13 = vld [vmem:[%s1919_s1 + $0x50] sm:$0xff] }
0x1499   :  { %v1457_v4 = vpop.eup %1456  ;;  %v974_v9 = vmul.f32 1.442695, %v962_v15  ;;  %v23_v15 = vld [vmem:[%s1919_s1 + $0x48] sm:$0xff] }
0x149a   :  { %v988_v11 = vsel %vm719_vm14, %v1457_v4, 0.0 }
0x149b   :  { %1458 = vpow2.f32 %v974_v9  ;;  %989 = vadd.xlane.f32.xlu0 %v988_v11 }
0x14a1   :  { %v1459_v12 = vpop.eup %1458 }
0x14a2   :  { %v994_v16 = vsel %vm719_vm14, %v1459_v12, 0.0 }
0x14a3   :  { %995 = vadd.xlane.f32.xlu2 %v994_v16 }
0x14a5   :  { %v951_v17 = vpop.xlane.xlu0 %950 }
0x14a6   :  { %v963_v19 = vsub.f32 %v931_v37, %v951_v17 }
0x14a7   :  { %v957_v20 = vpop.xlane.xlu1 %956 }
0x14a8   :  { %v976_v21 = vmul.f32 1.442695, %v963_v19  ;;  %v965_v22 = vsub.f32 %v933_v39, %v957_v20 }
0x14aa   :  { %1460 = vpow2.f32 %v976_v21  ;;  %v980_v1 = vmul.f32 1.442695, %v965_v22 }
0x14ac   :  { %1462 = vpow2.f32 %v980_v1 }
0x14af   :  { %1378 = vrot.lane.b32.xlu0 %v1377_v2, %s1507_s0  ;;  %v987_v33 = vpop.xlane.xlu1 %986 }
0x14b0   :  { %v1869_v25 = vpop.eup %1460 }
0x14b1   :  { %v997_v26 = vsel %vm719_vm14, %v1869_v25, 0.0 }
0x14b2   :  { %998 = vadd.xlane.f32.xlu1 %v997_v26  ;;  %v1463_v28 = vpop.eup %1462 }
0x14b3   :  { %v984_v27 = vpop.xlane.xlu2 %983  ;;  %v1003_v63 = vsel %vm719_vm14, %v1463_v28, 0.0 }
0x14b4   :  { %1464 = vrcp.f32 %v984_v27 }
0x14b7   :  { %1204 = vrot.lane.b32.xlu0 %v1816_v10, %s1507_s0 }
0x14b8   :  { %v1369_v29 = vpop.permute.xlu0 %1368 }
0x14b9   :  { %v1371_v3 = vunpack.i.h.bf16 %v1369_v29  ;;  %v1370_v54 = vunpack.i.l.bf16 %v1369_v29 }
0x14ba   :  { %v1465_v23 = vpop.eup %1464  ;;  %1004 = vadd.xlane.f32.xlu1 %v1003_v63 }
0x14bb   :  { %v1014_v31 = vmul.f32 %v1465_v23, %v1451_v50  ;;  %1043 = vmatpush.msrb.mxu2 %v1370_v54  ;;  %1095 = vmatpush.msra.mxu0 %v1371_v3 }
0x14bc   :  { %1373 = vrot.lane.b32.xlu2 %v1372_v30, %s1507_s0 }
0x14bd   :  { %1345 = vmatmul.msk.f32.vlgmr.msrb.gmra.mxu2 %vm719_vm14, %v1014_v31 }
0x14d3   :  { %1152 = vrot.lane.b32.xlu1 %v1812_v24, %s1507_s0  ;;  %s1516_s0 = smov [#allocation2]  }
0x14d4   :  { %s1298_s21 = sshll.u32 %s1516_s0, 4  ;;  %s1299_s21 = int_to_ptr.vmem [resolvable:$true] %s1298_s21 }
0x1506   :  { %v1002_v10 = vpop.xlane.xlu2 %1001 }
0x1507   :  { %v993_v14 = vpop.xlane.xlu1 %992 }
0x150e   :  { %v990_v32 = vpop.xlane.xlu0 %989 }
0x150f   :  { %1466 = vrcp.f32 %v990_v32 }
0x1510   :  { %1468 = vrcp.f32 %v987_v33 }
0x1515   :  { %v1467_v34 = vpop.eup %1466 }
0x1516   :  { %v1016_v35 = vmul.f32 %v1467_v34, %v1457_v4  ;;  %v996_v45 = vpop.xlane.xlu2 %995  ;;  %v1469_v5 = vpop.eup %1468 }
0x1517   :  { %1470 = vrcp.f32 %v996_v45  ;;  %v1015_v38 = vmul.f32 %v1469_v5, %v1848_v47 }
0x1518   :  { %1347 = vmatmul.msk.f32.vlgmr.msra.gmra.mxu0 %vm719_vm14, %v1016_v35  ;;  %1472 = vrcp.f32 %v1002_v10 }
0x1519   :  { %1474 = vrcp.f32 %v993_v14 }
0x151d   :  { %v1471_v49 = vpop.eup %1470 }
0x151e   :  { %v1374_v0 = vpop.permute.xlu2 %1373  ;;  %v1473_v46 = vpop.eup %1472  ;;  %v1018_v39 = vmul.f32 %v1471_v49, %v1459_v12 }
0x151f   :  { %v1376_v36 = vunpack.i.h.bf16 %v1374_v0  ;;  %v1375_v24 = vunpack.i.l.bf16 %v1374_v0  ;;  %v1475_v37 = vpop.eup %1474  ;;  %v1020_v43 = vmul.f32 %v1473_v46, %v1856_v60 }
0x1520   :  { %v1017_v44 = vmul.f32 %v1475_v37, %v1858_v62 }
0x1521   :  { %v1379_v40 = vpop.permute.xlu0 %1378  ;;  %1069 = vmatpush.msrb.mxu3 %v1375_v24  ;;  %1147 = vmatpush.msra.mxu2 %v1376_v36 }
0x1522   :  { %v1381_v18 = vunpack.i.h.bf16 %v1379_v40  ;;  %v1380_v42 = vunpack.i.l.bf16 %v1379_v40  ;;  %1346 = vmatmul.msk.f32.vlgmr.msrb.gmra.mxu3 %vm719_vm14, %v1015_v38  ;;  %1349 = vmatmul.msk.f32.vlgmr.msra.gmra.mxu2 %vm719_vm14, %v1018_v39 }
0x1523   :  { %1281 = vmatpush.msrb.mxu2 %v26_v7 }
0x1524   :  { %1121 = vmatpush.msrb.mxu1 %v1380_v42  ;;  %1199 = vmatpush.msrb.mxu0 %v1381_v18 }
0x1525   :  { %v999_v48 = vpop.xlane.xlu1 %998  ;;  %1348 = vmatmul.msk.f32.vlgmr.msrb.gmra.mxu1 %vm719_vm14, %v1017_v44  ;;  %1351 = vmatmul.msk.f32.vlgmr.msrb.gmra.mxu0 %vm719_vm14, %v1020_v43 }
0x1526   :  { %1282 = vmatpush.msrb.mxu2 %v25_v8 }
0x1528   :  { %1283 = vmatpush.msrb.mxu2 %v24_v13 }
0x1529   :  { %v1205_v47 = vpop.permute.xlu0 %1204 }
0x152a   :  { %1225 = vmatpush.msra.mxu1 %v1205_v47  ;;  %1284 = vmatpush.msrb.mxu2 %v23_v15 }
0x152d   :  { %v1005_v50 = vpop.xlane.xlu1 %1004 }
0x152e   :  { %1476 = vrcp.f32 %v1005_v50 }
0x152f   :  { %1478 = vrcp.f32 %v999_v48 }
0x1534   :  { %v1477_v6 = vpop.eup %1476 }
0x1535   :  { %v1021_v41 = vmul.f32 %v1477_v6, %v1463_v28  ;;  %v1479_v51 = vpop.eup %1478 }
0x1536   :  { %v1019_v52 = vmul.f32 %v1479_v51, %v1869_v25  ;;  %v1383_v25 = vld [vmem:[%s1919_s1 + $0x68] ss:$0 sm:$0xff] }
0x1537   :  { %1352 = vmatmul.msk.f32.vlgmr.msra.gmra.mxu1 %vm719_vm14, %v1021_v41 }
0x1540   :  { %v1045_v56 = vpop.f32.mrf.mxu2 }
0x1545   :  { %v1153_v53 = vpop.permute.xlu1 %1152 }
0x1546   :  { %1173 = vmatpush.msra.mxu3 %v1153_v53 }
0x1547   :  { %1350 = vmatmul.msk.f32.vlgmr.msra.gmra.mxu3 %vm719_vm14, %v1019_v52 }
0x1595   :  { %v1097_v55 = vpop.f32.mrf.mxu0 }
0x1596   :  { %1232 = vrot.lane.b32.xlu0 %v1097_v55, %s1513_s8 }
0x15a2   :  { %v1201_v57 = vpop.f32.mrf.mxu0  ;;  %v1123_v59 = vpop.f32.mrf.mxu1 }
0x15a3   :  { %1248 = vrot.lane.b32.xlu0 %v1201_v57, %s1514_s9 }
0x15a5   :  { %v1149_v58 = vpop.f32.mrf.mxu2  ;;  %v1071_v61 = vpop.f32.mrf.mxu3 }
0x15a6   :  { %1240 = vrot.lane.b32.xlu2 %v1149_v58, %s1515_s10 }
0x15ae   :  { %1234 = vrot.lane.b32.xlu2 %v1123_v59, %s1513_s8 }
0x15b4   :  { %v1227_v60 = vpop.f32.mrf.mxu1 }
0x15b5   :  { %1250 = vrot.lane.b32.xlu0 %v1227_v60, %s1514_s9 }
0x15ca   :  { %v1175_v62 = vpop.f32.mrf.mxu3 }
0x15cb   :  { %1242 = vrot.lane.b32.xlu1 %v1175_v62, %s1515_s10 }
0x1600   :  { %v1241_v11 = vpop.permute.xlu2 %1240 }
0x1608   :  { %v1233_v4 = vpop.permute.xlu0 %1232  ;;  %v1235_v19 = vpop.permute.xlu2 %1234 }
0x1609   :  { %v1254_v9 = vsel %vm719_vm14, %v1045_v56, %v1233_v4  ;;  %v1255_v20 = vsel %vm719_vm14, %v1071_v61, %v1235_v19 }
0x160a   :  { %v1257_v16 = vsel %vm1256_vm15, %v1254_v9, %v1241_v11 }
0x1615   :  { %v1249_v12 = vpop.permute.xlu0 %1248 }
0x1616   :  { %v1260_v17 = vsel %vm1259_vm0, %v1257_v16, %v1249_v12 }
0x1617   :  { %1353 = vmatmul.msk.f32.vlgmr.msrb.gmra.mxu2 %vm55_vm6, %v1260_v17 }
0x1627   :  { %v1251_v22 = vpop.permute.xlu0 %1250 }
0x163d   :  { %v1243_v21 = vpop.permute.xlu1 %1242 }
0x163e   :  { %v1258_v1 = vsel %vm1256_vm15, %v1255_v20, %v1243_v21 }
0x163f   :  { %v1261_v2 = vsel %vm1259_vm0, %v1258_v1, %v1251_v22 }
0x1640   :  { %1354 = vmatmul.msk.f32.gmra.mxu2 %vm55_vm6, %v1261_v2 }
0x169a   :  { %v1286_v26 = vpop.f32.mrf.mxu2 }
0x169b   :  { %v1287_v27 = vadd.f32 %v1383_v25, %v1286_v26 }
0x169d   :  { %1292 = vst [vmem:[#allocation2] sm:$0xff] %v1287_v27 }
0x16c3   :  { %v1289_v28 = vpop.f32.mrf.mxu2 }
0x16c4   :  { %v1290_v29 = vadd.f32 %v1383_v25, %v1289_v28 }
0x16c6   :  { %1293 = vst [vmem:[#allocation2 + $0x8] sm:$0xff] %v1290_v29 }
0x16c7   :  { %1306 = dma.vmem_to_hbm [thread:$0]  %s1299_s21, 256, %s1301_s24, [#allocation3], %s1517_s25, %s1517_s25, %s1513_s8  }
0x16c8   :  { %1504 = dma.done.wait [#allocation3], 256  }
0x16c9   :  { %1505 = vsyncadd [#allocation3], 4294967040 }
0x16ca   :  { %1311 = vsyncpa [#allocation3], 1 }

</bundles_post_ra>
